<compile_context>
chip_gen: v7x
topology: tpu7x:2x2x1
jax: 0.10.0
libtpu: 0.0.40
codegen_flags: <defaults>
</compile_context>

<pallas_src>
import math

import jax
import jax.numpy as jnp
from jax.experimental import pallas as pl
from jax.experimental.pallas import tpu as pltpu

EPS = 1e-5
MXU_DTYPE = jnp.bfloat16        # MXU operands; accumulation stays f32


def _resnet_block_kernel(x_ref, xup_ref, xdn_ref, w_ref, o_ref,
                         y_scr, sum_scr, sq_scr):
    """One (batch n, H-tile t) grid step.

    x_ref:   (1, tH, W, C)  rows [t*tH, (t+1)*tH) of the NHWC input
    xup_ref: (1, 1,  W, C)  halo row above the tile (reflected at the border)
    xdn_ref: (1, 1,  W, C)  halo row below the tile (reflected at the border)
    w_ref:   (3, 3, Ci, Co) conv weights (bf16)
    o_ref:   (1, H, W, C)   full-image output block, resident across the H axis;
                            also used to stage x for the residual add
    y_scr:   (H, W, C) f32  conv output for the current image
    sum_scr: (1, C)    f32  running per-channel sum of y
    sq_scr:  (1, C)    f32  running per-channel sum of y*y
    """
    t = pl.program_id(1)
    n_tiles = pl.num_programs(1)
    _, tH, W, C = x_ref.shape
    H = o_ref.shape[1]

    @pl.when(t == 0)
    def _init():
        sum_scr[...] = jnp.zeros_like(sum_scr)
        sq_scr[...] = jnp.zeros_like(sq_scr)

    # ---- stage the residual into the (resident) output block ---------------
    r0 = pl.multiple_of(t * tH, tH)
    xm_f32 = x_ref[0]                                   # (tH, W, C) f32
    o_ref[0, pl.ds(r0, tH)] = xm_f32

    # ---- H-extended tile (halo rows) and the 3 W-shifted slabs (bf16) ------
    xe = jnp.concatenate([xup_ref[0], xm_f32, xdn_ref[0]],
                         axis=0).astype(MXU_DTYPE)      # (tH+2, W, C)
    # reflect-pad of width 1 along W, expressed as three reusable slabs
    sl0 = jnp.concatenate([xe[:, 1:2], xe[:, :W - 1]], axis=1)      # cols w-1
    sl2 = jnp.concatenate([xe[:, 1:], xe[:, W - 2:W - 1]], axis=1)  # cols w+1
    slabs = (sl0, xe, sl2)

    # ---- 3x3 conv as 9 (tH,W,Ci)x(Ci,Co) MXU contractions -------------------
    acc = jnp.zeros((tH, W, C), jnp.float32)
    for kw in range(3):
        slab = slabs[kw]
        for kh in range(3):
            patch = slab[kh:kh + tH]        # cheap outer-dim slice (aligned)
            w_kk = w_ref[kh, kw]            # (Ci, Co) bf16
            acc = acc + jax.lax.dot_general(
                patch, w_kk,
                dimension_numbers=(((2,), (0,)), ((), ())),
                preferred_element_type=jnp.float32)
    # NOTE: the conv bias is intentionally omitted — affine-free InstanceNorm
    # subtracts the per-channel mean, which cancels it exactly.

    # ---- stream InstanceNorm statistics (single pass, f32) ------------------
    y_scr[pl.ds(r0, tH)] = acc
    s = jnp.sum(acc, axis=(0, 1), keepdims=True)        # (1, 1, C)
    s2 = jnp.sum(acc * acc, axis=(0, 1), keepdims=True)
    sum_scr[...] = sum_scr[...] + s[0]
    sq_scr[...] = sq_scr[...] + s2[0]

    # ---- finalize: normalize + residual, write the whole image -------------
    @pl.when(t == n_tiles - 1)
    def _finalize():
        inv_n = 1.0 / float(H * W)
        mean = sum_scr[...] * inv_n                      # (1, C)
        var = sq_scr[...] * inv_n - mean * mean
        inv_std = jax.lax.rsqrt(var + EPS)               # (1, C)
        out = o_ref[0] + (y_scr[...] - mean) * inv_std   # broadcasts over (H,W,C)
        o_ref[0] = out.astype(o_ref.dtype)


def _pick_tile_h(H):
    for cand in (64, 32, 16, 8):
        if cand < H and H % cand == 0:
            return cand
    return H


@jax.jit
def resnet_block(x_nchw, w_oihw, bias=None):
    """out = x + InstanceNorm(Conv3x3(ReflectPad1(x))), NCHW in / NCHW out.

    `bias` is accepted for API parity with the PyTorch Conv2d(bias=True) but is
    never read: an affine-free InstanceNorm cancels a per-channel bias exactly.
    """
    del bias
    N, C, H, W = x_nchw.shape
    assert H >= 2 and W >= 2, "reflection padding of 1 needs spatial dims >= 2"

    # TODO(synk): keep the surrounding model in NHWC so these two transposes
    # (a full HBM read+write of the activation each) disappear.
    x_nhwc = jnp.transpose(x_nchw, (0, 2, 3, 1))                      # (N,H,W,C)
    w_kkio = jnp.transpose(w_oihw, (2, 3, 1, 0)).astype(MXU_DTYPE)    # (3,3,Ci,Co)

    tH = _pick_tile_h(H)
    nT = H // tH

    def x_map(n, t):
        return (n, t, 0, 0)

    def xup_map(n, t):       # row above the tile; reflect row -1 -> row 1
        return (n, jnp.where(t == 0, 1, t * tH - 1), 0, 0)

    def xdn_map(n, t):       # row below the tile; reflect row H -> row H-2
        return (n, jnp.where(t == nT - 1, H - 2, (t + 1) * tH), 0, 0)

    out_nhwc = pl.pallas_call(
        _resnet_block_kernel,
        out_shape=jax.ShapeDtypeStruct((N, H, W, C), x_nchw.dtype),
        grid_spec=pltpu.PrefetchScalarGridSpec(
            num_scalar_prefetch=0,
            grid=(N, nT),
            in_specs=[
                pl.BlockSpec((1, tH, W, C), x_map),
                pl.BlockSpec((1, 1, W, C), xup_map),
                pl.BlockSpec((1, 1, W, C), xdn_map),
                pl.BlockSpec((3, 3, C, C), lambda n, t: (0, 0, 0, 0)),
            ],
            out_specs=pl.BlockSpec((1, H, W, C), lambda n, t: (n, 0, 0, 0)),
            scratch_shapes=[
                pltpu.VMEM((H, W, C), jnp.float32),   # conv output y
                pltpu.VMEM((1, C), jnp.float32),      # sum(y) per channel
                pltpu.VMEM((1, C), jnp.float32),      # sum(y*y) per channel
            ],
        ),
        compiler_params=pltpu.CompilerParams(
            dimension_semantics=("parallel", "arbitrary"),
            vmem_limit_bytes=56 * 1024 * 1024,
        ),
    )(x_nhwc, x_nhwc, x_nhwc, w_kkio)

    return jnp.transpose(out_nhwc, (0, 3, 1, 2))                      # NCHW


def ref_forward(x_nchw, w_oihw, bias):
    """Pure-JAX f32 reference mirroring the PyTorch module (bias included)."""
    xp = jnp.pad(x_nchw, ((0, 0), (0, 0), (1, 1), (1, 1)), mode="reflect")
    y = jax.lax.conv_general_dilated(
        xp, w_oihw, window_strides=(1, 1), padding="VALID",
        dimension_numbers=("NCHW", "OIHW", "NCHW"))
    y = y + bias[None, :, None, None]
    mean = jnp.mean(y, axis=(2, 3), keepdims=True)
    var = jnp.mean((y - mean) ** 2, axis=(2, 3), keepdims=True)
    return x_nchw + (y - mean) * jax.lax.rsqrt(var + EPS)


if __name__ == "__main__":
    N, C, H, W = 2, 4, 16, 16
    key = jax.random.PRNGKey(0)
    kx, kw_, kb = jax.random.split(key, 3)

    x = jax.random.normal(kx, (N, C, H, W), dtype=jnp.float32)
    # Deterministic synthetic parameters (Conv2d(dim, dim, 3, bias=True)).
    fan_in = C * 3 * 3
    bound = 1.0 / math.sqrt(fan_in)
    w = jax.random.uniform(kw_, (C, C, 3, 3), jnp.float32, -bound, bound)
    b = jax.random.uniform(kb, (C,), jnp.float32, -bound, bound)

    out = jax.block_until_ready(resnet_block(x, w, b))
    ref = ref_forward(x, w, b)

    assert out.shape == (N, C, H, W)
    max_err = float(jnp.max(jnp.abs(out - ref)))
    # bf16 MXU operands with f32 accumulation -> loosened tolerance vs f32 ref.
    assert jnp.allclose(out, ref, atol=5e-2, rtol=5e-2), max_err

    print("KERNEL_OK")
</pallas_src>

<mosaic_0001>
module attributes {stable_mosaic.version = 11 : i64} {
  func.func @_resnet_block_kernel(%arg0: i32, %arg1: i32, %arg2: memref<1x8x16x4xf32, #tpu.memory_space<vmem>>, %arg3: memref<1x1x16x4xf32, #tpu.memory_space<vmem>>, %arg4: memref<1x1x16x4xf32, #tpu.memory_space<vmem>>, %arg5: memref<3x3x4x4xbf16, #tpu.memory_space<vmem>>, %arg6: memref<1x16x16x4xf32, #tpu.memory_space<vmem>>, %arg7: memref<16x16x4xf32, #tpu.memory_space<vmem>>, %arg8: memref<1x4xf32, #tpu.memory_space<vmem>>, %arg9: memref<1x4xf32, #tpu.memory_space<vmem>>) attributes {dimension_semantics = [#tpu.dimension_semantics<parallel>, #tpu.dimension_semantics<arbitrary>], iteration_bounds = array<i64: 2, 2>, scalar_prefetch = 0 : i64, scratch_operands = 3 : i64, tpu.core_type = #tpu.core_type<tc>, window_params = [{transform_indices = @transform_0, window_bounds = array<i64: 1, 8, 16, 4>}, {transform_indices = @transform_1, window_bounds = array<i64: 1, 1, 16, 4>}, {transform_indices = @transform_2, window_bounds = array<i64: 1, 1, 16, 4>}, {pipeline_mode = #tpu.pipeline_mode<synchronous>, transform_indices = @transform_3, window_bounds = array<i64: 3, 3, 4, 4>}, {transform_indices = @transform_4, window_bounds = array<i64: 1, 16, 16, 4>}]} {
    %c0_i32 = arith.constant 0 : i32
    %0 = arith.cmpi eq, %arg1, %c0_i32 : i32
    %1 = arith.extui %0 : i1 to i32
    %c0_i32_0 = arith.constant 0 : i32
    %2 = arith.cmpi ne, %1, %c0_i32_0 : i32
    scf.if %2 {
      %cst_71 = arith.constant 0.000000e+00 : f32
      %87 = vector.broadcast %cst_71 : f32 to vector<1x4xf32>
      %c0_72 = arith.constant 0 : index
      %c0_73 = arith.constant 0 : index
      %88 = vector.load %arg8[%c0_72, %c0_73] : memref<1x4xf32, #tpu.memory_space<vmem>>, vector<1x4xf32>
      tpu.vector_store %arg8[%c0_72, %c0_73], %87 {strides = array<i32>} : memref<1x4xf32, #tpu.memory_space<vmem>>, vector<1x4xf32>,
      %cst_74 = arith.constant 0.000000e+00 : f32
      %89 = vector.broadcast %cst_74 : f32 to vector<1x4xf32>
      %c0_75 = arith.constant 0 : index
      %c0_76 = arith.constant 0 : index
      %90 = vector.load %arg9[%c0_75, %c0_76] : memref<1x4xf32, #tpu.memory_space<vmem>>, vector<1x4xf32>
      tpu.vector_store %arg9[%c0_75, %c0_76], %89 {strides = array<i32>} : memref<1x4xf32, #tpu.memory_space<vmem>>, vector<1x4xf32>,
    } else {
    }
    %c8_i32 = arith.constant 8 : i32
    %3 = arith.muli %arg1, %c8_i32 : i32
    %4 = tpu.assume_multiple %3, 8 : i32
    %c0 = arith.constant 0 : index
    %c0_1 = arith.constant 0 : index
    %c0_2 = arith.constant 0 : index
    %c0_3 = arith.constant 0 : index
    %5 = vector.load %arg2[%c0, %c0_1, %c0_2, %c0_3] : memref<1x8x16x4xf32, #tpu.memory_space<vmem>>, vector<1x8x16x4xf32>
    %6 = vector.shape_cast %5 : vector<1x8x16x4xf32> to vector<8x16x4xf32>
    %c0_4 = arith.constant 0 : index
    %7 = arith.index_cast %4 : i32 to index
    %c0_5 = arith.constant 0 : index
    %c0_6 = arith.constant 0 : index
    %8 = vector.load %arg6[%c0_4, %7, %c0_5, %c0_6] : memref<1x16x16x4xf32, #tpu.memory_space<vmem>>, vector<1x8x16x4xf32>
    %9 = vector.shape_cast %8 : vector<1x8x16x4xf32> to vector<8x16x4xf32>
    %10 = vector.shape_cast %6 : vector<8x16x4xf32> to vector<1x8x16x4xf32>
    tpu.vector_store %arg6[%c0_4, %7, %c0_5, %c0_6], %10 {strides = array<i32>} : memref<1x16x16x4xf32, #tpu.memory_space<vmem>>, vector<1x8x16x4xf32>,
    %c0_7 = arith.constant 0 : index
    %c0_8 = arith.constant 0 : index
    %c0_9 = arith.constant 0 : index
    %c0_10 = arith.constant 0 : index
    %11 = vector.load %arg3[%c0_7, %c0_8, %c0_9, %c0_10] : memref<1x1x16x4xf32, #tpu.memory_space<vmem>>, vector<1x1x16x4xf32>
    %12 = vector.shape_cast %11 : vector<1x1x16x4xf32> to vector<1x16x4xf32>
    %c0_11 = arith.constant 0 : index
    %c0_12 = arith.constant 0 : index
    %c0_13 = arith.constant 0 : index
    %c0_14 = arith.constant 0 : index
    %13 = vector.load %arg4[%c0_11, %c0_12, %c0_13, %c0_14] : memref<1x1x16x4xf32, #tpu.memory_space<vmem>>, vector<1x1x16x4xf32>
    %14 = vector.shape_cast %13 : vector<1x1x16x4xf32> to vector<1x16x4xf32>
    %15 = tpu.concatenate %12, %6, %14 in 0 : vector<1x16x4xf32>, vector<8x16x4xf32>, vector<1x16x4xf32> -> vector<10x16x4xf32>
    %16 = arith.truncf %15 : vector<10x16x4xf32> to vector<10x16x4xbf16>
    %17 = vector.extract_strided_slice %16 {offsets = [0, 1, 0], sizes = [10, 1, 4], strides = [1, 1, 1]} : vector<10x16x4xbf16> to vector<10x1x4xbf16>
    %18 = vector.extract_strided_slice %16 {offsets = [0, 0, 0], sizes = [10, 15, 4], strides = [1, 1, 1]} : vector<10x16x4xbf16> to vector<10x15x4xbf16>
    %19 = tpu.concatenate %17, %18 in 1 : vector<10x1x4xbf16>, vector<10x15x4xbf16> -> vector<10x16x4xbf16>
    %20 = vector.extract_strided_slice %16 {offsets = [0, 1, 0], sizes = [10, 15, 4], strides = [1, 1, 1]} : vector<10x16x4xbf16> to vector<10x15x4xbf16>
    %21 = vector.extract_strided_slice %16 {offsets = [0, 14, 0], sizes = [10, 1, 4], strides = [1, 1, 1]} : vector<10x16x4xbf16> to vector<10x1x4xbf16>
    %22 = tpu.concatenate %20, %21 in 1 : vector<10x15x4xbf16>, vector<10x1x4xbf16> -> vector<10x16x4xbf16>
    %cst = arith.constant 0.000000e+00 : f32
    %23 = vector.broadcast %cst : f32 to vector<8x16x4xf32>
    %24 = vector.extract_strided_slice %19 {offsets = [0, 0, 0], sizes = [8, 16, 4], strides = [1, 1, 1]} : vector<10x16x4xbf16> to vector<8x16x4xbf16>
    %c0_15 = arith.constant 0 : index
    %c0_16 = arith.constant 0 : index
    %c0_17 = arith.constant 0 : index
    %c0_18 = arith.constant 0 : index
    %25 = vector.load %arg5[%c0_15, %c0_16, %c0_17, %c0_18] : memref<3x3x4x4xbf16, #tpu.memory_space<vmem>>, vector<1x1x4x4xbf16>
    %26 = vector.shape_cast %25 : vector<1x1x4x4xbf16> to vector<4x4xbf16>
    %cst_19 = arith.constant dense<0.000000e+00> : vector<8x16x4xf32>
    %27 = tpu.matmul %24, %26, %cst_19 {dimension_numbers = #tpu.dot_dimension_numbers<[2], [0], [0, 1], [1], [0, 0, 0, 1, 1, 1], [], []>} : vector<8x16x4xbf16>, vector<4x4xbf16>, vector<8x16x4xf32> -> vector<8x16x4xf32>
    %28 = arith.addf %23, %27 : vector<8x16x4xf32>
    %29 = vector.extract_strided_slice %19 {offsets = [1, 0, 0], sizes = [8, 16, 4], strides = [1, 1, 1]} : vector<10x16x4xbf16> to vector<8x16x4xbf16>
    %c1 = arith.constant 1 : index
    %c0_20 = arith.constant 0 : index
    %c0_21 = arith.constant 0 : index
    %c0_22 = arith.constant 0 : index
    %30 = vector.load %arg5[%c1, %c0_20, %c0_21, %c0_22] : memref<3x3x4x4xbf16, #tpu.memory_space<vmem>>, vector<1x1x4x4xbf16>
    %31 = vector.shape_cast %30 : vector<1x1x4x4xbf16> to vector<4x4xbf16>
    %cst_23 = arith.constant dense<0.000000e+00> : vector<8x16x4xf32>
    %32 = tpu.matmul %29, %31, %cst_23 {dimension_numbers = #tpu.dot_dimension_numbers<[2], [0], [0, 1], [1], [0, 0, 0, 1, 1, 1], [], []>} : vector<8x16x4xbf16>, vector<4x4xbf16>, vector<8x16x4xf32> -> vector<8x16x4xf32>
    %33 = arith.addf %28, %32 : vector<8x16x4xf32>
    %34 = vector.extract_strided_slice %19 {offsets = [2, 0, 0], sizes = [8, 16, 4], strides = [1, 1, 1]} : vector<10x16x4xbf16> to vector<8x16x4xbf16>
    %c2 = arith.constant 2 : index
    %c0_24 = arith.constant 0 : index
    %c0_25 = arith.constant 0 : index
    %c0_26 = arith.constant 0 : index
    %35 = vector.load %arg5[%c2, %c0_24, %c0_25, %c0_26] : memref<3x3x4x4xbf16, #tpu.memory_space<vmem>>, vector<1x1x4x4xbf16>
    %36 = vector.shape_cast %35 : vector<1x1x4x4xbf16> to vector<4x4xbf16>
    %cst_27 = arith.constant dense<0.000000e+00> : vector<8x16x4xf32>
    %37 = tpu.matmul %34, %36, %cst_27 {dimension_numbers = #tpu.dot_dimension_numbers<[2], [0], [0, 1], [1], [0, 0, 0, 1, 1, 1], [], []>} : vector<8x16x4xbf16>, vector<4x4xbf16>, vector<8x16x4xf32> -> vector<8x16x4xf32>
    %38 = arith.addf %33, %37 : vector<8x16x4xf32>
    %39 = vector.extract_strided_slice %16 {offsets = [0, 0, 0], sizes = [8, 16, 4], strides = [1, 1, 1]} : vector<10x16x4xbf16> to vector<8x16x4xbf16>
    %c0_28 = arith.constant 0 : index
    %c1_29 = arith.constant 1 : index
    %c0_30 = arith.constant 0 : index
    %c0_31 = arith.constant 0 : index
    %40 = vector.load %arg5[%c0_28, %c1_29, %c0_30, %c0_31] : memref<3x3x4x4xbf16, #tpu.memory_space<vmem>>, vector<1x1x4x4xbf16>
    %41 = vector.shape_cast %40 : vector<1x1x4x4xbf16> to vector<4x4xbf16>
    %cst_32 = arith.constant dense<0.000000e+00> : vector<8x16x4xf32>
    %42 = tpu.matmul %39, %41, %cst_32 {dimension_numbers = #tpu.dot_dimension_numbers<[2], [0], [0, 1], [1], [0, 0, 0, 1, 1, 1], [], []>} : vector<8x16x4xbf16>, vector<4x4xbf16>, vector<8x16x4xf32> -> vector<8x16x4xf32>
    %43 = arith.addf %38, %42 : vector<8x16x4xf32>
    %44 = vector.extract_strided_slice %16 {offsets = [1, 0, 0], sizes = [8, 16, 4], strides = [1, 1, 1]} : vector<10x16x4xbf16> to vector<8x16x4xbf16>
    %c1_33 = arith.constant 1 : index
    %c1_34 = arith.constant 1 : index
    %c0_35 = arith.constant 0 : index
    %c0_36 = arith.constant 0 : index
    %45 = vector.load %arg5[%c1_33, %c1_34, %c0_35, %c0_36] : memref<3x3x4x4xbf16, #tpu.memory_space<vmem>>, vector<1x1x4x4xbf16>
    %46 = vector.shape_cast %45 : vector<1x1x4x4xbf16> to vector<4x4xbf16>
    %cst_37 = arith.constant dense<0.000000e+00> : vector<8x16x4xf32>
    %47 = tpu.matmul %44, %46, %cst_37 {dimension_numbers = #tpu.dot_dimension_numbers<[2], [0], [0, 1], [1], [0, 0, 0, 1, 1, 1], [], []>} : vector<8x16x4xbf16>, vector<4x4xbf16>, vector<8x16x4xf32> -> vector<8x16x4xf32>
    %48 = arith.addf %43, %47 : vector<8x16x4xf32>
    %49 = vector.extract_strided_slice %16 {offsets = [2, 0, 0], sizes = [8, 16, 4], strides = [1, 1, 1]} : vector<10x16x4xbf16> to vector<8x16x4xbf16>
    %c2_38 = arith.constant 2 : index
    %c1_39 = arith.constant 1 : index
    %c0_40 = arith.constant 0 : index
    %c0_41 = arith.constant 0 : index
    %50 = vector.load %arg5[%c2_38, %c1_39, %c0_40, %c0_41] : memref<3x3x4x4xbf16, #tpu.memory_space<vmem>>, vector<1x1x4x4xbf16>
    %51 = vector.shape_cast %50 : vector<1x1x4x4xbf16> to vector<4x4xbf16>
    %cst_42 = arith.constant dense<0.000000e+00> : vector<8x16x4xf32>
    %52 = tpu.matmul %49, %51, %cst_42 {dimension_numbers = #tpu.dot_dimension_numbers<[2], [0], [0, 1], [1], [0, 0, 0, 1, 1, 1], [], []>} : vector<8x16x4xbf16>, vector<4x4xbf16>, vector<8x16x4xf32> -> vector<8x16x4xf32>
    %53 = arith.addf %48, %52 : vector<8x16x4xf32>
    %54 = vector.extract_strided_slice %22 {offsets = [0, 0, 0], sizes = [8, 16, 4], strides = [1, 1, 1]} : vector<10x16x4xbf16> to vector<8x16x4xbf16>
    %c0_43 = arith.constant 0 : index
    %c2_44 = arith.constant 2 : index
    %c0_45 = arith.constant 0 : index
    %c0_46 = arith.constant 0 : index
    %55 = vector.load %arg5[%c0_43, %c2_44, %c0_45, %c0_46] : memref<3x3x4x4xbf16, #tpu.memory_space<vmem>>, vector<1x1x4x4xbf16>
    %56 = vector.shape_cast %55 : vector<1x1x4x4xbf16> to vector<4x4xbf16>
    %cst_47 = arith.constant dense<0.000000e+00> : vector<8x16x4xf32>
    %57 = tpu.matmul %54, %56, %cst_47 {dimension_numbers = #tpu.dot_dimension_numbers<[2], [0], [0, 1], [1], [0, 0, 0, 1, 1, 1], [], []>} : vector<8x16x4xbf16>, vector<4x4xbf16>, vector<8x16x4xf32> -> vector<8x16x4xf32>
    %58 = arith.addf %53, %57 : vector<8x16x4xf32>
    %59 = vector.extract_strided_slice %22 {offsets = [1, 0, 0], sizes = [8, 16, 4], strides = [1, 1, 1]} : vector<10x16x4xbf16> to vector<8x16x4xbf16>
    %c1_48 = arith.constant 1 : index
    %c2_49 = arith.constant 2 : index
    %c0_50 = arith.constant 0 : index
    %c0_51 = arith.constant 0 : index
    %60 = vector.load %arg5[%c1_48, %c2_49, %c0_50, %c0_51] : memref<3x3x4x4xbf16, #tpu.memory_space<vmem>>, vector<1x1x4x4xbf16>
    %61 = vector.shape_cast %60 : vector<1x1x4x4xbf16> to vector<4x4xbf16>
    %cst_52 = arith.constant dense<0.000000e+00> : vector<8x16x4xf32>
    %62 = tpu.matmul %59, %61, %cst_52 {dimension_numbers = #tpu.dot_dimension_numbers<[2], [0], [0, 1], [1], [0, 0, 0, 1, 1, 1], [], []>} : vector<8x16x4xbf16>, vector<4x4xbf16>, vector<8x16x4xf32> -> vector<8x16x4xf32>
    %63 = arith.addf %58, %62 : vector<8x16x4xf32>
    %64 = vector.extract_strided_slice %22 {offsets = [2, 0, 0], sizes = [8, 16, 4], strides = [1, 1, 1]} : vector<10x16x4xbf16> to vector<8x16x4xbf16>
    %c2_53 = arith.constant 2 : index
    %c2_54 = arith.constant 2 : index
    %c0_55 = arith.constant 0 : index
    %c0_56 = arith.constant 0 : index
    %65 = vector.load %arg5[%c2_53, %c2_54, %c0_55, %c0_56] : memref<3x3x4x4xbf16, #tpu.memory_space<vmem>>, vector<1x1x4x4xbf16>
    %66 = vector.shape_cast %65 : vector<1x1x4x4xbf16> to vector<4x4xbf16>
    %cst_57 = arith.constant dense<0.000000e+00> : vector<8x16x4xf32>
    %67 = tpu.matmul %64, %66, %cst_57 {dimension_numbers = #tpu.dot_dimension_numbers<[2], [0], [0, 1], [1], [0, 0, 0, 1, 1, 1], [], []>} : vector<8x16x4xbf16>, vector<4x4xbf16>, vector<8x16x4xf32> -> vector<8x16x4xf32>
    %68 = arith.addf %63, %67 : vector<8x16x4xf32>
    %69 = arith.index_cast %4 : i32 to index
    %c0_58 = arith.constant 0 : index
    %c0_59 = arith.constant 0 : index
    %70 = vector.load %arg7[%69, %c0_58, %c0_59] : memref<16x16x4xf32, #tpu.memory_space<vmem>>, vector<8x16x4xf32>
    tpu.vector_store %arg7[%69, %c0_58, %c0_59], %68 {strides = array<i32>} : memref<16x16x4xf32, #tpu.memory_space<vmem>>, vector<8x16x4xf32>,
    %cst_60 = arith.constant dense<0.000000e+00> : vector<4xf32>
    %71 = vector.multi_reduction <add>, %68, %cst_60 [0, 1] : vector<8x16x4xf32> to vector<4xf32>
    %72 = vector.shape_cast %71 : vector<4xf32> to vector<1x1x4xf32>
    %73 = arith.mulf %68, %68 : vector<8x16x4xf32>
    %cst_61 = arith.constant dense<0.000000e+00> : vector<4xf32>
    %74 = vector.multi_reduction <add>, %73, %cst_61 [0, 1] : vector<8x16x4xf32> to vector<4xf32>
    %75 = vector.shape_cast %74 : vector<4xf32> to vector<1x1x4xf32>
    %c0_62 = arith.constant 0 : index
    %c0_63 = arith.constant 0 : index
    %76 = vector.load %arg8[%c0_62, %c0_63] : memref<1x4xf32, #tpu.memory_space<vmem>>, vector<1x4xf32>
    %77 = vector.shape_cast %72 : vector<1x1x4xf32> to vector<1x4xf32>
    %78 = arith.addf %76, %77 : vector<1x4xf32>
    %c0_64 = arith.constant 0 : index
    %c0_65 = arith.constant 0 : index
    %79 = vector.load %arg8[%c0_64, %c0_65] : memref<1x4xf32, #tpu.memory_space<vmem>>, vector<1x4xf32>
    tpu.vector_store %arg8[%c0_64, %c0_65], %78 {strides = array<i32>} : memref<1x4xf32, #tpu.memory_space<vmem>>, vector<1x4xf32>,
    %c0_66 = arith.constant 0 : index
    %c0_67 = arith.constant 0 : index
    %80 = vector.load %arg9[%c0_66, %c0_67] : memref<1x4xf32, #tpu.memory_space<vmem>>, vector<1x4xf32>
    %81 = vector.shape_cast %75 : vector<1x1x4xf32> to vector<1x4xf32>
    %82 = arith.addf %80, %81 : vector<1x4xf32>
    %c0_68 = arith.constant 0 : index
    %c0_69 = arith.constant 0 : index
    %83 = vector.load %arg9[%c0_68, %c0_69] : memref<1x4xf32, #tpu.memory_space<vmem>>, vector<1x4xf32>
    tpu.vector_store %arg9[%c0_68, %c0_69], %82 {strides = array<i32>} : memref<1x4xf32, #tpu.memory_space<vmem>>, vector<1x4xf32>,
    %c1_i32 = arith.constant 1 : i32
    %84 = arith.cmpi eq, %arg1, %c1_i32 : i32
    %85 = arith.extui %84 : i1 to i32
    %c0_i32_70 = arith.constant 0 : i32
    %86 = arith.cmpi ne, %85, %c0_i32_70 : i32
    scf.if %86 {
      %c0_71 = arith.constant 0 : index
      %c0_72 = arith.constant 0 : index
      %87 = vector.load %arg8[%c0_71, %c0_72] : memref<1x4xf32, #tpu.memory_space<vmem>>, vector<1x4xf32>
      %cst_73 = arith.constant 3.906250e-03 : f32
      %88 = vector.broadcast %cst_73 : f32 to vector<1x4xf32>
      %89 = arith.mulf %87, %88 : vector<1x4xf32>
      %c0_74 = arith.constant 0 : index
      %c0_75 = arith.constant 0 : index
      %90 = vector.load %arg9[%c0_74, %c0_75] : memref<1x4xf32, #tpu.memory_space<vmem>>, vector<1x4xf32>
      %cst_76 = arith.constant 3.906250e-03 : f32
      %91 = vector.broadcast %cst_76 : f32 to vector<1x4xf32>
      %92 = arith.mulf %90, %91 : vector<1x4xf32>
      %93 = arith.mulf %89, %89 : vector<1x4xf32>
      %94 = arith.subf %92, %93 : vector<1x4xf32>
      %cst_77 = arith.constant 9.99999974E-6 : f32
      %95 = vector.broadcast %cst_77 : f32 to vector<1x4xf32>
      %96 = arith.addf %94, %95 : vector<1x4xf32>
      %97 = math.rsqrt %96 : vector<1x4xf32>
      %c0_78 = arith.constant 0 : index
      %c0_79 = arith.constant 0 : index
      %c0_80 = arith.constant 0 : index
      %c0_81 = arith.constant 0 : index
      %98 = vector.load %arg6[%c0_78, %c0_79, %c0_80, %c0_81] : memref<1x16x16x4xf32, #tpu.memory_space<vmem>>, vector<1x16x16x4xf32>
      %99 = vector.shape_cast %98 : vector<1x16x16x4xf32> to vector<16x16x4xf32>
      %c0_82 = arith.constant 0 : index
      %c0_83 = arith.constant 0 : index
      %c0_84 = arith.constant 0 : index
      %100 = vector.load %arg7[%c0_82, %c0_83, %c0_84] : memref<16x16x4xf32, #tpu.memory_space<vmem>>, vector<16x16x4xf32>
      %101 = vector.shape_cast %89 : vector<1x4xf32> to vector<1x1x4xf32>
      %102 = vector.broadcast %101 : vector<1x1x4xf32> to vector<16x16x4xf32>
      %103 = arith.subf %100, %102 : vector<16x16x4xf32>
      %104 = vector.shape_cast %97 : vector<1x4xf32> to vector<1x1x4xf32>
      %105 = vector.broadcast %104 : vector<1x1x4xf32> to vector<16x16x4xf32>
      %106 = arith.mulf %103, %105 : vector<16x16x4xf32>
      %107 = arith.addf %99, %106 : vector<16x16x4xf32>
      %c0_85 = arith.constant 0 : index
      %c0_86 = arith.constant 0 : index
      %c0_87 = arith.constant 0 : index
      %c0_88 = arith.constant 0 : index
      %108 = vector.load %arg6[%c0_85, %c0_86, %c0_87, %c0_88] : memref<1x16x16x4xf32, #tpu.memory_space<vmem>>, vector<1x16x16x4xf32>
      %109 = vector.shape_cast %108 : vector<1x16x16x4xf32> to vector<16x16x4xf32>
      %110 = vector.shape_cast %107 : vector<16x16x4xf32> to vector<1x16x16x4xf32>
      tpu.vector_store %arg6[%c0_85, %c0_86, %c0_87, %c0_88], %110 {strides = array<i32>} : memref<1x16x16x4xf32, #tpu.memory_space<vmem>>, vector<1x16x16x4xf32>,
    } else {
    }
    return
  }
  func.func @transform_0(%arg0: i32, %arg1: i32) -> (i32, i32, i32, i32) {
    %c0_i32 = arith.constant 0 : i32
    %c0_i32_0 = arith.constant 0 : i32
    %c0_i32_1 = arith.constant 0 : i32
    return %arg0, %arg1, %c0_i32, %c0_i32_0 : i32, i32, i32, i32
  }
  func.func @transform_1(%arg0: i32, %arg1: i32) -> (i32, i32, i32, i32) {
    %c0_i32 = arith.constant 0 : i32
    %0 = arith.cmpi eq, %arg1, %c0_i32 : i32
    %c8_i32 = arith.constant 8 : i32
    %1 = arith.muli %arg1, %c8_i32 : i32
    %c1_i32 = arith.constant 1 : i32
    %2 = arith.subi %1, %c1_i32 : i32
    %c1_i32_0 = arith.constant 1 : i32
    %3 = arith.select %0, %c1_i32_0, %2 : i32
    %c0_i32_1 = arith.constant 0 : i32
    %c0_i32_2 = arith.constant 0 : i32
    %c0_i32_3 = arith.constant 0 : i32
    return %arg0, %3, %c0_i32_1, %c0_i32_2 : i32, i32, i32, i32
  }
  func.func @transform_2(%arg0: i32, %arg1: i32) -> (i32, i32, i32, i32) {
    %c1_i32 = arith.constant 1 : i32
    %0 = arith.cmpi eq, %arg1, %c1_i32 : i32
    %c1_i32_0 = arith.constant 1 : i32
    %1 = arith.addi %arg1, %c1_i32_0 : i32
    %c8_i32 = arith.constant 8 : i32
    %2 = arith.muli %1, %c8_i32 : i32
    %c14_i32 = arith.constant 14 : i32
    %3 = arith.select %0, %c14_i32, %2 : i32
    %c0_i32 = arith.constant 0 : i32
    %c0_i32_1 = arith.constant 0 : i32
    %c0_i32_2 = arith.constant 0 : i32
    return %arg0, %3, %c0_i32, %c0_i32_1 : i32, i32, i32, i32
  }
  func.func @transform_3(%arg0: i32, %arg1: i32) -> (i32, i32, i32, i32) {
    %c0_i32 = arith.constant 0 : i32
    %c0_i32_0 = arith.constant 0 : i32
    %c0_i32_1 = arith.constant 0 : i32
    %c0_i32_2 = arith.constant 0 : i32
    %c0_i32_3 = arith.constant 0 : i32
    return %c0_i32, %c0_i32_0, %c0_i32_1, %c0_i32_2 : i32, i32, i32, i32
  }
  func.func @transform_4(%arg0: i32, %arg1: i32) -> (i32, i32, i32, i32) {
    %c0_i32 = arith.constant 0 : i32
    %c0_i32_0 = arith.constant 0 : i32
    %c0_i32_1 = arith.constant 0 : i32
    %c0_i32_2 = arith.constant 0 : i32
    return %arg0, %c0_i32, %c0_i32_0, %c0_i32_1 : i32, i32, i32, i32
  }
}

</mosaic_0001>

<bundles_post_ra>
// kernel: resnet_block.1
= control target key start
LH: loop header
LB: loop body
LE: loop exit
PB: predicated region body
PF: predicated region fallthrough
CT: control target
= control target key end

     0   :  { %s2740_s15 = smov 0   ;;  %s2742_s16 = smov 0   ;;  %s3608_s0 = inlined_call_operand.vmem [shape: f32[2,16,16,4], index: 0, kind: input, shape index: {}, may-alias: {0,1,2}]   ;;  %s3609_s1 = inlined_call_operand.vmem [shape: f32[2,16,16,4], index: 1, kind: input, shape index: {}, may-alias: {0,1,2}]   ;;  %s3610_s2 = inlined_call_operand.vmem [shape: f32[2,16,16,4], index: 2, kind: input, shape index: {}, may-alias: {0,1,2}]   ;;  %s3611_s3 = inlined_call_operand.vmem [shape: bf16[3,3,4,4], index: 3, kind: input, shape index: {}]   ;;  %s3612_s4 = inlined_call_operand.vmem [shape: f32[2,16,16,4], index: 4, kind: output, shape index: {}]  }
   0x1   :  { %s2744_s17 = smov 0   ;;  %s2746_s18 = smov 0  }
   0x2   :  { %s2748_s19 = smov 0  }
   0x3 LB: > { %s23_s20 = sadd.s32 1, %s2704_s17  ;;  %s26_s21 = sadd.s32 1, %s2708_s18  ;;  %s2712_s19 = sphi %s2748_s19, %s14_s19   ;;  %s2708_s18 = sphi %s2746_s18, %s3630_s18   ;;  %s2704_s17 = sphi %s2744_s17, %s3629_s17   ;;  %s2700_s16 = sphi %s2742_s16, %s3628_s16   ;;  %s2696_s15 = sphi %s2740_s15, %s3627_s15  }
   0x4   : > { %p24_p0 = scmp.ge.s32.totalorder %s23_s20, 2  ;;  %p2138_p1 = scmp.ge.s32.totalorder %s2712_s19, 1 }
   0x5   : > { %p246_p2 = scmp.lt.s32.totalorder %s2712_s19, 5 }
   0x6   : > { %s3632_s20 = smov (%p24_p0, %s23_s20), 0  ;;  %s3634_s21 = smov (!%p24_p0, %s26_s21), %s2708_s18 }
   0x7   : > { %p247_p3 = pnand %p2138_p1, %p246_p2  ;;  %p28_p4 = scmp.ge.s32.totalorder %s3634_s21, 2 }
   0x8   : > { %s2139_s22 = sshll.u32 (!%p247_p3), %s2696_s15, 3  ;;  %p304_p5 = scmp.lt.s32.totalorder (!%p247_p3), %s2700_s16, 1 }
   0x9   : > { %s3636_s21 = smov (%p28_p4, %s3634_s21), 0  ;;  %250 = sbr.rel (%p247_p3) target bundleno = 470 (0x1d6), region = 36 }
   0xa   : > { %p306_p6 = scmp.lt.s32.totalorder (!%p247_p3), %s2139_s22, 15  ;;  %p314_p7 = scmp.eq.s32.totalorder (!%p247_p3), %s2696_s15, 0 }
   0xb   : > { %s2144_s25 = sadd.s32 (!%p247_p3), 4294967295, %s2139_s22  ;;  %p331_p8 = scmp.eq.s32.totalorder (!%p247_p3), %s2696_s15, 1 }
   0xc   : > { %s2245_s28 = sadd.s32 (!%p247_p3), 8, %s2139_s22  ;;  %p2154_p11 = scmp.ne.s32.totalorder (!%p247_p3), %s2696_s15, 0 }
  0x10   : > { %s3638_s16 = smov (!%p304_p5, %s2700_s16), 1  ;;  %s3640_s25 = smov (%p314_p7, %s2144_s25), 1 }
  0x11   : > { %s307_s23 = scalar_select %p306_p6, %s2139_s22, 15 }
  0x12   : > { %s2141_s24 = sshll.u32 %s3638_s16, 5  ;;  %s2246_s30 = sshll.u32 %s3638_s16, 8  ;;  %vm358_vm0 = vcmask (!%p2154_p11), 24576   ;;  %v2714_v0 = vmov (!%p2154_p11), 0.0  }
  0x13   : > { %s2140_s26 = sshll.u32 %s307_s23, 1  ;;  %s2783_s10 = scalar_lea.vmem %s3612_s4, %s2246_s30  ;;  %359 = vst.msk [vmem:[#allocation3] sm:$0x1] (!%p2154_p11), %vm358_vm0, %v2714_v0  ;;  %360 = vst.msk [vmem:[#allocation4] sm:$0x1] (!%p2154_p11), %vm358_vm0, %v2714_v0 }
  0x14   : > { %s310_s27 = sadd.s32 %s2141_s24, %s2140_s26  ;;  %s3642_s28 = smov (%p331_p8, %s2245_s28), 14 }
  0x15   : > { %s2142_s29 = sshll.u32 %s310_s27, 3  ;;  %p320_p9 = scmp.lt.s32.totalorder %s3640_s25, 15 }
  0x16   : > { %s2778_s7 = scalar_lea.vmem %s3608_s0, %s2142_s29  ;;  %p337_p10 = scmp.lt.s32.totalorder %s3642_s28, 15 }
  0x17   : > { %s3644_s25 = smov (!%p320_p9, %s3640_s25), 15  ;;  %357 = sbr.rel (%p2154_p11) target bundleno = 30 (0x1e), region = 40 }
  0x18   : > { %s3646_s28 = smov (!%p337_p10, %s3642_s28), 15  ;;  %s2145_s11 = sshll.u32 %s3644_s25, 1 }
  0x19   : > { %s324_s12 = sadd.s32 %s2145_s11, %s2141_s24  ;;  %s2149_s13 = sshll.u32 %s3646_s28, 1 }
  0x1a   : > { %s2147_s14 = sshll.u32 %s324_s12, 3  ;;  %s341_s16 = sadd.s32 %s2149_s13, %s2141_s24 }
  0x1b   : > { %s2788_s26 = scalar_lea.vmem %s3609_s1, %s2147_s14  ;;  %s2151_s27 = sshll.u32 %s341_s16, 3 }
  0x1c   : > { %s2793_s5 = scalar_lea.vmem %s3610_s2, %s2151_s27 }
  0x1e PF: > { %vm594_vm1 = vcmask 1041408   ;;  %v2799_v1 = vld [vmem:[%s3611_s3 + $0x8] sm:$0x3]  ;;  %v362_v2 = vld [vmem:[%s2778_s7] sm:$0xff]  ;;  %s2247_s28 = sshll.u32 %s2696_s15, 7  ;;  %vm380_vm2 = vcmask 31744  }
  0x1f   : > { %v363_v3 = vld [vmem:[%s2778_s7 + $0x8] sm:$0xff]  ;;  %2625 = vmatprep.subr.msk.bf16.mxu0 %vm594_vm1, %v2799_v1  ;;  %v2808_v4 = vsel %vm594_vm1, %v2799_v1, 0  ;;  %s2813_s6 = scalar_lea.vmem %s2783_s10, %s2247_s28  ;;  %v364_v6 = vld [vmem:[%s2778_s7 + $0x10] sm:$0xff]  ;;  %v365_v7 = vld [vmem:[%s2778_s7 + $0x18] sm:$0xff]  ;;  %vm501_vm3 = vcmask 1040384   ;;  %vm554_vm6 = vcmask 1047552  }
  0x20   : > { %v2815_v5 = vpack.c.bf16 %v363_v3, %v362_v2  ;;  %v2157_v8 = vld [vmem:[%s3611_s3 + $0x6] sm:$0x3]  ;;  %2402 = vmatpush3.bf16.msra.mxu0 %v2808_v4  ;;  %381 = vst.msk [vmem:[%s2813_s6] sm:$0xff] %vm380_vm2, %v362_v2  ;;  %382 = vst.msk [vmem:[%s2813_s6 + $0x8] sm:$0xff] %vm380_vm2, %v363_v3  ;;  %v2831_v9 = vpack.c.bf16 %v365_v7, %v364_v6  ;;  %vm502_vm4 = vsmask.f32 256 }
  0x21   : > { %383 = vst.msk [vmem:[%s2813_s6 + $0x10] sm:$0xff] %vm380_vm2, %v364_v6  ;;  %384 = vst.msk [vmem:[%s2813_s6 + $0x18] sm:$0xff] %vm380_vm2, %v365_v7  ;;  %2621 = vmatprep.subr.msk.bf16.mxu1 %vm594_vm1, %v2157_v8  ;;  %v596_v10 = vsel %vm594_vm1, %v2157_v8, 0  ;;  %v567_v11 = vld [vmem:[%s3611_s3] sm:$0x3]  ;;  %v367_v20 = vld [vmem:[%s2778_s7 + $0x28] sm:$0xff] }
  0x22   : > { %2403 = vmatprep.mubr.msk.bf16.mxu0 %vm380_vm2, %v2815_v5  ;;  %2330 = vmatpush3.bf16.msra.mxu1 %v596_v10  ;;  %v2841_v12 = vshrl.u32 %v2815_v5, 16  ;;  %v2844_v13 = vshll.u32 %v2815_v5, 16  ;;  %vm2846_vm5 = vmand %vm501_vm3, %vm502_vm4  ;;  %v2201_v15 = vld [vmem:[%s3611_s3 + $0xe] sm:$0x3]  ;;  %v366_v16 = vld [vmem:[%s2778_s7 + $0x20] sm:$0xff]  ;;  %v2857_v17 = vshrl.u32 %v2831_v9, 16 }
  0x23   : > { %2622 = vmatprep.subr.msk.bf16.mxu1 %vm594_vm1, %v567_v11  ;;  %2627 = vmatprep.subr.msk.bf16.mxu0 %vm594_vm1, %v2201_v15  ;;  %v2860_v18 = vshll.u32 %v2831_v9, 16  ;;  %v1178_v19 = vsel %vm594_vm1, %v2201_v15, 0  ;;  %385 = vst.msk [vmem:[%s2813_s6 + $0x20] sm:$0xff] %vm380_vm2, %v366_v16  ;;  %v368_v21 = vld [vmem:[%s2778_s7 + $0x30] sm:$0xff]  ;;  %v369_v22 = vld [vmem:[%s2778_s7 + $0x38] sm:$0xff]  ;;  %386 = vst.msk [vmem:[%s2813_s6 + $0x28] sm:$0xff] %vm380_vm2, %v367_v20  ;;  %v2873_v24 = vpack.c.bf16 %v367_v20, %v366_v16 }
  0x24   : > { %2404 = vmatmul.mubr.msk.bf16.vlgmr.msra.gmra.mrb[0].mxu0 %vm380_vm2, %v2831_v9  ;;  %v455_v23 = vrot.slane %v2841_v12, 7  ;;  %387 = vst.msk [vmem:[%s2813_s6 + $0x30] sm:$0xff] %vm380_vm2, %v368_v21  ;;  %388 = vst.msk [vmem:[%s2813_s6 + $0x38] sm:$0xff] %vm380_vm2, %v369_v22  ;;  %v2879_v25 = vpack.c.bf16 %v369_v22, %v368_v21  ;;  %v370_v26 = vld [vmem:[%s2778_s7 + $0x40] sm:$0xff]  ;;  %v371_v27 = vld [vmem:[%s2778_s7 + $0x48] sm:$0xff]  ;;  %v459_v29 = vrot.slane %v2857_v17, 7 }
  0x25   : > { %v2210_v28 = vld [vmem:[%s3611_s3 + $0x4] sm:$0x3]  ;;  %2420 = vmatpush3.bf16.msra.mxu0 %v1178_v19  ;;  %389 = vst.msk [vmem:[%s2813_s6 + $0x40] sm:$0xff] %vm380_vm2, %v370_v26  ;;  %390 = vst.msk [vmem:[%s2813_s6 + $0x48] sm:$0xff] %vm380_vm2, %v371_v27  ;;  %v2891_v30 = vpack.c.bf16 %v371_v27, %v370_v26  ;;  %v372_v31 = vld [vmem:[%s2778_s7 + $0x50] sm:$0xff]  ;;  %v699_v35 = vsel %vm594_vm1, %v567_v11, 0  ;;  %2407 = vmatprep.mubr.msk.bf16.mxu0 %vm380_vm2, %v2873_v24 }
  0x26   : > { %v373_v32 = vld [vmem:[%s2778_s7 + $0x58] sm:$0xff]  ;;  %v374_v33 = vld [vmem:[%s2778_s7 + $0x60] sm:$0xff]  ;;  %v458_v34 = vor.u32 %v2844_v13, %v455_v23  ;;  %v2901_v36 = vshrl.u32 %v2873_v24, 16  ;;  %v2904_v37 = vshll.u32 %v2873_v24, 16  ;;  %2628 = vmatprep.subr.msk.bf16.mxu0 %vm594_vm1, %v2210_v28  ;;  %391 = vst.msk [vmem:[%s2813_s6 + $0x50] sm:$0xff] %vm380_vm2, %v372_v31  ;;  %v375_v38 = vld [vmem:[%s2778_s7 + $0x68] sm:$0xff]  ;;  %v462_v41 = vor.u32 %v2860_v18, %v459_v29 }
  0x27   : > { %392 = vst.msk [vmem:[%s2813_s6 + $0x58] sm:$0xff] %vm380_vm2, %v373_v32  ;;  %393 = vst.msk [vmem:[%s2813_s6 + $0x60] sm:$0xff] %vm380_vm2, %v374_v33  ;;  %v376_v39 = vld [vmem:[%s2778_s7 + $0x70] sm:$0xff]  ;;  %v377_v40 = vld [vmem:[%s2778_s7 + $0x78] sm:$0xff]  ;;  %v2918_v42 = vshrl.u32 %v2879_v25, 16  ;;  %v2921_v43 = vshll.u32 %v2879_v25, 16  ;;  %v2941_v48 = vpack.c.bf16 %v373_v32, %v372_v31  ;;  %v2952_v52 = vpack.c.bf16 %v375_v38, %v374_v33 }
  0x28   : > { %v2924_v44 = vshrl.u32 %v2891_v30, 16  ;;  %394 = vst.msk [vmem:[%s2813_s6 + $0x68] sm:$0xff] %vm380_vm2, %v375_v38  ;;  %395 = vst.msk [vmem:[%s2813_s6 + $0x70] sm:$0xff] %vm380_vm2, %v376_v39  ;;  %v2935_v45 = vsel %vm2846_vm5, %v2841_v12, %v458_v34  ;;  %v463_v46 = vrot.slane %v2901_v36, 7  ;;  %v2939_v47 = vshll.u32 %v2891_v30, 16  ;;  %v397_v60 = vld [vmem:[%s2788_s26] sm:$0xff] }
  0x29   : > { %396 = vst.msk [vmem:[%s2813_s6 + $0x78] sm:$0xff] %vm380_vm2, %v377_v40  ;;  %2331 = vmatprep.mubr.msk.bf16.mxu1 %vm380_vm2, %v2935_v45  ;;  %v2948_v49 = vsel %vm2846_vm5, %v2857_v17, %v462_v41  ;;  %v467_v50 = vrot.slane %v2918_v42, 7  ;;  %v2957_v53 = vld [vmem:[%s3611_s3 + $0xc] sm:$0x3]  ;;  %v2964_v56 = vshrl.u32 %v2941_v48, 16  ;;  %v2975_v59 = vshrl.u32 %v2952_v52, 16 }
  0x2a   : > { %v471_v51 = vrot.slane %v2924_v44, 7  ;;  %2332 = vmatmul.mubr.msk.bf16.vlgmr.msra.gmra.mrb[0].mxu1 %vm380_vm2, %v2948_v49  ;;  %v466_v54 = vor.u32 %v2904_v37, %v463_v46  ;;  %v398_v61 = vld [vmem:[%s2788_s26 + $0x8] sm:$0xff]  ;;  %v2992_v0 = vshll.u32 %v2941_v48, 16  ;;  %v2994_v2 = vpack.c.bf16 %v377_v40, %v376_v39  ;;  %v399_v41 = vld [vmem:[%s2793_s5] sm:$0xff]  ;;  %s3206_s25 = scalar_lea.vmem [#allocation2], %s2247_s28  ;;  %p2237_p12 = scmp.ne.s32.totalorder %s2696_s15, 1 }
  0x2b   : > { %2348 = vmatpush3.bf16.msra.mxu1 %v699_v35  ;;  %v470_v55 = vor.u32 %v2921_v43, %v467_v50  ;;  %v475_v63 = vrot.slane %v2964_v56, 7  ;;  %v479_v6 = vrot.slane %v2975_v59, 7  ;;  %v3003_v7 = vshll.u32 %v2952_v52, 16  ;;  %v2219_v16 = vld [vmem:[%s3611_s3 + $0xa] sm:$0x3] }
  0x2c   : > { %2408 = vmatmul.mubr.msk.bf16.gmra.mrb[4].mxu0 %vm380_vm2, %v2879_v25  ;;  %v2971_v57 = vsel %vm2846_vm5, %v2901_v36, %v466_v54  ;;  %v474_v58 = vor.u32 %v2939_v47, %v471_v51  ;;  %2623 = vmatprep.subr.msk.bf16.mxu1 %vm594_vm1, %v2957_v53  ;;  %v3005_v8 = vpack.c.bf16 %v398_v61, %v397_v60  ;;  %v1320_v10 = vsel %vm594_vm1, %v2210_v28, 0  ;;  %v400_v46 = vld [vmem:[%s2793_s5 + $0x8] sm:$0xff] }
  0x2d   : > { %2335 = vmatprep.mubr.msk.bf16.mxu1 %vm380_vm2, %v2971_v57  ;;  %2421 = vmatprep.mubr.msk.bf16.mxu0 %vm380_vm2, %v2831_v9  ;;  %v2988_v62 = vsel %vm2846_vm5, %v2918_v42, %v470_v55  ;;  %v478_v11 = vor.u32 %v2992_v0, %v475_v63  ;;  %v436_v15 = vshrl.u32 %v2994_v2, 16  ;;  %v482_v19 = vor.u32 %v3003_v7, %v479_v6 }
  0x2e   : > { %v2999_v3 = vsel %vm2846_vm5, %v2924_v44, %v474_v58  ;;  %v412_v20 = vshrl.u32 %v3005_v8, 16  ;;  %v484_v21 = vshll.u32 %v2994_v2, 16  ;;  %v452_v26 = vshll.u32 %v3005_v8, 16  ;;  %v2183_v58 = vld [vmem:[%s3611_s3 + $0x2] sm:$0x3] }
  0x2f   : > { %v3028_v22 = vsel %vm2846_vm5, %v2964_v56, %v478_v11  ;;  %v483_v23 = vrot.slane %v436_v15, 7  ;;  %v3034_v27 = vsel %vm2846_vm5, %v2975_v59, %v482_v19  ;;  %vm555_vm7 = vsmask.f32 7424 }
  0x30   : > { %v451_v28 = vrot.slane %v412_v20, 7  ;;  %v530_v29 = vrot.slane %v484_v21, 1  ;;  %vm3040_vm8 = vmand %vm554_vm6, %vm555_vm7  ;;  %v514_v40 = vrot.slane %v452_v26, 1  ;;  %v804_v51 = vsel %vm594_vm1, %v2957_v53, 0 }
  0x31   : > { %v486_v32 = vor.u32 %v484_v21, %v483_v23  ;;  %v410_v54 = vpack.c.bf16 %v400_v46, %v399_v41  ;;  %v516_v55 = vrot.slane %v2844_v13, 1  ;;  %v518_v61 = vrot.slane %v2860_v18, 1 }
  0x32   : > { %2336 = vmatmul.mubr.msk.bf16.gmra.mrb[4].mxu1 %vm380_vm2, %v2988_v62  ;;  %v531_v31 = vor.u32 %v530_v29, %v436_v15  ;;  %v454_v34 = vor.u32 %v452_v26, %v451_v28  ;;  %v515_v50 = vor.u32 %v514_v40, %v412_v20  ;;  %v520_v6 = vrot.slane %v2904_v37, 1 }
  0x33   : > { %2339 = vmatprep.mubr.msk.bf16.mxu1 %vm380_vm2, %v2999_v3  ;;  %v3054_v38 = vsel %vm2846_vm5, %v436_v15, %v486_v32  ;;  %v517_v53 = vor.u32 %v516_v55, %v2841_v12  ;;  %v519_v63 = vor.u32 %v518_v61, %v2857_v17  ;;  %v522_v12 = vrot.slane %v2921_v43, 1 }
  0x34   : > { %2422 = vmatmul.mubr.msk.bf16.vlgmr.msra.gmra.mrb[0].mxu0 %vm380_vm2, %v2873_v24  ;;  %v3048_v35 = vsel %vm3040_vm8, %v531_v31, %v484_v21  ;;  %v504_v39 = vsel %vm2846_vm5, %v412_v20, %v454_v34  ;;  %v557_v60 = vsel %vm3040_vm8, %v515_v50, %v452_v26  ;;  %v521_v17 = vor.u32 %v520_v6, %v2901_v36 }
  0x35   : > { %2438 = vmatpush3.bf16.msra.mxu0 %v1320_v10  ;;  %2425 = vmatprep.mubr.msk.bf16.mxu0 %vm380_vm2, %v2879_v25  ;;  %v1441_v10 = vsel %vm594_vm1, %v2219_v16, 0  ;;  %v559_v11 = vsel %vm3040_vm8, %v519_v63, %v2860_v18  ;;  %v523_v15 = vor.u32 %v522_v12, %v2918_v42  ;;  %v526_v20 = vrot.slane %v2992_v0, 1 }
  0x36   : > { %2629 = vmatprep.subr.msk.bf16.mxu0 %vm594_vm1, %v2219_v16  ;;  %v560_v18 = vsel %vm3040_vm8, %v521_v17, %v2904_v37  ;;  %v524_v16 = vrot.slane %v2939_v47, 1  ;;  %v528_v21 = vrot.slane %v3003_v7, 1  ;;  %vm1786_vm9 = vcmask 24576  }
  0x37   : > { %v561_v19 = vsel %vm3040_vm8, %v523_v15, %v2921_v43  ;;  %v527_v37 = vor.u32 %v526_v20, %v2964_v56 }
  0x38   : > { %v525_v36 = vor.u32 %v524_v16, %v2924_v44  ;;  %v529_v44 = vor.u32 %v528_v21, %v2975_v59  ;;  %v488_v59 = vshll.u32 %v410_v54, 16 }
  0x39   : > { %v563_v43 = vsel %vm3040_vm8, %v527_v37, %v2992_v0 }
  0x3a   : > { %2340 = vmatmul.mubr.msk.bf16.gmra.mrb[8].mxu1 %vm380_vm2, %v3028_v22  ;;  %v562_v42 = vsel %vm3040_vm8, %v525_v36, %v2939_v47  ;;  %v938_v47 = vsel %vm594_vm1, %v2183_v58, 0  ;;  %v564_v56 = vsel %vm3040_vm8, %v529_v44, %v3003_v7 }
  0x3b   : > { %2343 = vmatprep.mubr.msk.bf16.mxu1 %vm380_vm2, %v3034_v27 }
  0x3c   : > { %2426 = vmatmul.mubr.msk.bf16.gmra.mrb[4].mxu0 %vm380_vm2, %v2891_v30 }
  0x3d   : > { %2429 = vmatprep.mubr.msk.bf16.mxu0 %vm380_vm2, %v2941_v48 }
  0x42   : > { %2344 = vmatmul.mubr.msk.bf16.gmra.mrb[12].mxu1 %vm380_vm2, %v3054_v38 }
  0x43   : > { %2349 = vmatprep.mubr.msk.bf16.mxu1 %vm380_vm2, %v504_v39 }
  0x44   : > { %2430 = vmatmul.mubr.msk.bf16.gmra.mrb[8].mxu0 %vm380_vm2, %v2952_v52 }
  0x45   : > { %2433 = vmatprep.mubr.msk.bf16.mxu0 %vm380_vm2, %v2994_v2 }
  0x4a   : > { %2350 = vmatmul.mubr.msk.bf16.vlgmr.msra.gmra.mrb[0].mxu1 %vm380_vm2, %v2935_v45  ;;  %v558_v45 = vsel %vm3040_vm8, %v517_v53, %v2844_v13  ;;  %v2228_v13 = vld [vmem:[%s3611_s3 + $0x10] sm:$0x3] }
  0x4b   : > { %2366 = vmatpush3.bf16.msra.mxu1 %v804_v51  ;;  %2353 = vmatprep.mubr.msk.bf16.mxu1 %vm380_vm2, %v2948_v49 }
  0x4c   : > { %2434 = vmatmul.mubr.msk.bf16.gmra.mrb[12].mxu0 %vm380_vm2, %v410_v54  ;;  %2624 = vmatprep.subr.msk.bf16.mxu1 %vm594_vm1, %v2183_v58 }
  0x4d   : > { %2439 = vmatprep.mubr.msk.bf16.mxu0 %vm380_vm2, %v557_v60 }
  0x52   : > { %2354 = vmatmul.mubr.msk.bf16.gmra.mrb[4].mxu1 %vm380_vm2, %v2971_v57 }
  0x53   : > { %2357 = vmatprep.mubr.msk.bf16.mxu1 %vm380_vm2, %v2988_v62 }
  0x54   : > { %2440 = vmatmul.mubr.msk.bf16.vlgmr.msra.gmra.mrb[0].mxu0 %vm380_vm2, %v558_v45 }
  0x55   : > { %2456 = vmatpush3.bf16.msra.mxu0 %v1441_v10  ;;  %2443 = vmatprep.mubr.msk.bf16.mxu0 %vm380_vm2, %v559_v11 }
  0x56   : > { %2630 = vmatprep.subr.msk.bf16.mxu0 %vm594_vm1, %v2228_v13 }
  0x5a   : > { %2358 = vmatmul.mubr.msk.bf16.gmra.mrb[8].mxu1 %vm380_vm2, %v2999_v3 }
  0x5b   : > { %2361 = vmatprep.mubr.msk.bf16.mxu1 %vm380_vm2, %v3028_v22 }
  0x5c   : > { %2444 = vmatmul.mubr.msk.bf16.gmra.mrb[4].mxu0 %vm380_vm2, %v560_v18 }
  0x5d   : > { %2447 = vmatprep.mubr.msk.bf16.mxu0 %vm380_vm2, %v561_v19 }
  0x62   : > { %2362 = vmatmul.mubr.msk.bf16.gmra.mrb[12].mxu1 %vm380_vm2, %v3034_v27 }
  0x63   : > { %2367 = vmatprep.mubr.msk.bf16.mxu1 %vm380_vm2, %v2948_v49  ;;  %v1562_v49 = vsel %vm594_vm1, %v2228_v13, 0 }
  0x64   : > { %2448 = vmatmul.mubr.msk.bf16.gmra.mrb[8].mxu0 %vm380_vm2, %v562_v42 }
  0x65   : > { %2451 = vmatprep.mubr.msk.bf16.mxu0 %vm380_vm2, %v563_v43 }
  0x6a   : > { %2368 = vmatmul.mubr.msk.bf16.vlgmr.msra.gmra.mrb[0].mxu1 %vm380_vm2, %v2971_v57  ;;  %v439_v57 = vshrl.u32 %v410_v54, 16 }
  0x6b   : > { %2384 = vmatpush3.bf16.msra.mxu1 %v938_v47  ;;  %2371 = vmatprep.mubr.msk.bf16.mxu1 %vm380_vm2, %v2988_v62 }
  0x6c   : > { %2452 = vmatmul.mubr.msk.bf16.gmra.mrb[12].mxu0 %vm380_vm2, %v564_v56  ;;  %2626 = vmatprep.subr.msk.bf16.mxu1 %vm594_vm1, %v2799_v1  ;;  %v487_v62 = vrot.slane %v439_v57, 7 }
  0x6d   : > { %2457 = vmatprep.mubr.msk.bf16.mxu0 %vm380_vm2, %v558_v45 }
  0x6e   : > { %v490_v1 = vor.u32 %v488_v59, %v487_v62 }
  0x70   : > { %v513_v0 = vsel %vm2846_vm5, %v439_v57, %v490_v1 }
  0x72   : > { %2372 = vmatmul.mubr.msk.bf16.gmra.mrb[4].mxu1 %vm380_vm2, %v2999_v3 }
  0x73   : > { %2375 = vmatprep.mubr.msk.bf16.mxu1 %vm380_vm2, %v3028_v22 }
  0x74   : > { %2458 = vmatmul.mubr.msk.bf16.vlgmr.msra.gmra.mrb[0].mxu0 %vm380_vm2, %v559_v11 }
  0x75   : > { %2474 = vmatpush3.bf16.msra.mxu0 %v1562_v49  ;;  %2461 = vmatprep.mubr.msk.bf16.mxu0 %vm380_vm2, %v560_v18 }
  0x7a   : > { %2376 = vmatmul.mubr.msk.bf16.gmra.mrb[8].mxu1 %vm380_vm2, %v3034_v27 }
  0x7b   : > { %2379 = vmatprep.mubr.msk.bf16.mxu1 %vm380_vm2, %v3054_v38 }
  0x7c   : > { %2462 = vmatmul.mubr.msk.bf16.gmra.mrb[4].mxu0 %vm380_vm2, %v561_v19 }
  0x7d   : > { %2465 = vmatprep.mubr.msk.bf16.mxu0 %vm380_vm2, %v562_v42 }
  0x82   : > { %2380 = vmatmul.mubr.msk.bf16.gmra.mrb[12].mxu1 %vm380_vm2, %v513_v0 }
  0x83   : > { %2385 = vmatprep.mubr.msk.bf16.mxu1 %vm380_vm2, %v3005_v8 }
  0x84   : > { %2466 = vmatmul.mubr.msk.bf16.gmra.mrb[8].mxu0 %vm380_vm2, %v563_v43 }
  0x85   : > { %2469 = vmatprep.mubr.msk.bf16.mxu0 %vm380_vm2, %v564_v56 }
  0x8a   : > { %2386 = vmatmul.mubr.msk.bf16.vlgmr.msra.gmra.mrb[0].mxu1 %vm380_vm2, %v2815_v5 }
  0x8b   : > { %2492 = vmatpush3.bf16.msra.mxu1 %v2808_v4  ;;  %2389 = vmatprep.mubr.msk.bf16.mxu1 %vm380_vm2, %v2831_v9  ;;  %v532_v4 = vrot.slane %v488_v59, 1 }
  0x8c   : > { %2470 = vmatmul.mubr.msk.bf16.gmra.mrb[12].mxu0 %vm380_vm2, %v3048_v35 }
  0x8d   : > { %2475 = vmatprep.mubr.msk.bf16.mxu0 %vm380_vm2, %v559_v11  ;;  %v533_v5 = vor.u32 %v532_v4, %v439_v57 }
  0x8f   : > { %v566_v9 = vsel %vm3040_vm8, %v533_v5, %v488_v59 }
  0x92   : > { %2390 = vmatmul.mubr.msk.bf16.gmra.mrb[4].mxu1 %vm380_vm2, %v2873_v24 }
  0x93   : > { %2393 = vmatprep.mubr.msk.bf16.mxu1 %vm380_vm2, %v2879_v25 }
  0x94   : > { %2476 = vmatmul.mubr.msk.bf16.vlgmr.msra.gmra.mrb[0].mxu0 %vm380_vm2, %v560_v18 }
  0x95   : > { %2479 = vmatprep.mubr.msk.bf16.mxu0 %vm380_vm2, %v561_v19 }
  0x9a   : > { %2394 = vmatmul.mubr.msk.bf16.gmra.mrb[8].mxu1 %vm380_vm2, %v2891_v30 }
  0x9b   : > { %2397 = vmatprep.mubr.msk.bf16.mxu1 %vm380_vm2, %v2941_v48 }
  0x9c   : > { %2480 = vmatmul.mubr.msk.bf16.gmra.mrb[4].mxu0 %vm380_vm2, %v562_v42 }
  0x9d   : > { %2483 = vmatprep.mubr.msk.bf16.mxu0 %vm380_vm2, %v563_v43 }
  0xa2   : > { %2398 = vmatmul.mubr.msk.bf16.gmra.mrb[12].mxu1 %vm380_vm2, %v2952_v52 }
  0xa3   : > { %2411 = vmatprep.mubr.msk.bf16.mxu1 %vm380_vm2, %v2891_v30 }
  0xa4   : > { %2484 = vmatmul.mubr.msk.bf16.gmra.mrb[8].mxu0 %vm380_vm2, %v564_v56 }
  0xa5   : > { %2487 = vmatprep.mubr.msk.bf16.mxu0 %vm380_vm2, %v3048_v35 }
  0xaa   : > { %2412 = vmatmul.mubr.msk.bf16.vlgmr.msra.gmra.mrb[8].mxu1 %vm380_vm2, %v2941_v48 }
  0xab   : > { %2415 = vmatprep.mubr.msk.bf16.mxu1 %vm380_vm2, %v2952_v52 }
  0xac   : > { %2488 = vmatmul.mubr.msk.bf16.gmra.mrb[12].mxu0 %vm380_vm2, %v566_v9 }
  0xb2   : > { %2416 = vmatmul.mubr.msk.bf16.gmra.mrb[12].mxu1 %vm380_vm2, %v2994_v2 }
 0x15d   : > { %v2387_v14 = vpop.f32.mrb[0].mxu1 }
 0x15e   : > { %v974_v24 = vpop.f32.mrb[1].mxu1 }
 0x15f   : > { %v2388_v25 = vpop.f32.mrb[2].mxu1 }
 0x160   : > { %v977_v30 = vpop.f32.mrb[3].mxu1 }
 0x165   : > { %v2391_v3 = vpop.f32.mrb[4].mxu1 }
 0x166   : > { %v990_v7 = vpop.f32.mrb[5].mxu1 }
 0x167   : > { %v2392_v8 = vpop.f32.mrb[6].mxu1  ;;  %v2477_v22 = vpop.f32.mrb[0].mxu0 }
 0x168   : > { %v2493_v23 = vadd.f32 %v2477_v22, %v2387_v14  ;;  %v993_v26 = vpop.f32.mrb[7].mxu1  ;;  %v1598_v48 = vpop.f32.mrb[1].mxu0 }
 0x169   : > { %v2494_v27 = vadd.f32 %v1598_v48, %v974_v24  ;;  %v2478_v28 = vpop.f32.mrb[2].mxu0 }
 0x16a   : > { %1680 = vst.msk [vmem:[%s3206_s25 + $0x10] sm:$0xff] %vm380_vm2, %v2493_v23  ;;  %v2495_v52 = vadd.f32 %v2478_v28, %v2388_v25  ;;  %v1601_v2 = vpop.f32.mrb[3].mxu0  ;;  %v1733_v32 = vmul.f32 %v2493_v23, %v2493_v23  ;;  %v1697_v40 = vsel %vm380_vm2, %v2493_v23, 0.0 }
 0x16b   : > { %1678 = vst.msk [vmem:[%s3206_s25] sm:$0xff] %vm380_vm2, %v2494_v27  ;;  %v1731_v29 = vmul.f32 %v2494_v27, %v2494_v27  ;;  %v2496_v31 = vadd.f32 %v1601_v2, %v977_v30  ;;  %v1694_v33 = vsel %vm380_vm2, %v2494_v27, 0.0 }
 0x16c   : > { %1681 = vst.msk [vmem:[%s3206_s25 + $0x18] sm:$0xff] %vm380_vm2, %v2495_v52  ;;  %v1734_v38 = vmul.f32 %v2495_v52, %v2495_v52  ;;  %v1750_v60 = vsel %vm380_vm2, %v1733_v32, 0.0  ;;  %v1699_v61 = vsel %vm380_vm2, %v2495_v52, 0.0 }
 0x16d   : > { %1679 = vst.msk [vmem:[%s3206_s25 + $0x8] sm:$0xff] %vm380_vm2, %v2496_v31  ;;  %v1695_v34 = vsel %vm380_vm2, %v2496_v31, 0.0  ;;  %v1732_v35 = vmul.f32 %v2496_v31, %v2496_v31  ;;  %v1747_v41 = vsel %vm380_vm2, %v1731_v29, 0.0 }
 0x16e   : > { %v1696_v39 = vadd.f32 %v1695_v34, %v1694_v33  ;;  %v1752_v45 = vsel %vm380_vm2, %v1734_v38, 0.0 }
 0x16f   : > { %v1748_v46 = vsel %vm380_vm2, %v1732_v35, 0.0  ;;  %v2481_v50 = vpop.f32.mrb[4].mxu0 }
 0x170   : > { %v1698_v51 = vadd.f32 %v1697_v40, %v1696_v39  ;;  %v1749_v54 = vadd.f32 %v1748_v46, %v1747_v41  ;;  %v2497_v55 = vadd.f32 %v2481_v50, %v2391_v3  ;;  %v1614_v58 = vpop.f32.mrb[5].mxu0 }
 0x171   : > { %v2498_v53 = vadd.f32 %v1614_v58, %v990_v7  ;;  %v2482_v63 = vpop.f32.mrb[6].mxu0 }
 0x172   : > { %v1751_v6 = vadd.f32 %v1750_v60, %v1749_v54  ;;  %1684 = vst.msk [vmem:[%s3206_s25 + $0x30] sm:$0xff] %vm380_vm2, %v2497_v55  ;;  %v1700_v10 = vadd.f32 %v1699_v61, %v1698_v51  ;;  %v1617_v11 = vpop.f32.mrb[7].mxu0  ;;  %v2499_v17 = vadd.f32 %v2482_v63, %v2392_v8  ;;  %v1737_v36 = vmul.f32 %v2497_v55, %v2497_v55 }
 0x173   : > { %1682 = vst.msk [vmem:[%s3206_s25 + $0x20] sm:$0xff] %vm380_vm2, %v2498_v53  ;;  %v1701_v12 = vsel %vm380_vm2, %v2498_v53, 0.0  ;;  %v1735_v13 = vmul.f32 %v2498_v53, %v2498_v53  ;;  %v2500_v15 = vadd.f32 %v1617_v11, %v993_v26  ;;  %v1705_v43 = vsel %vm380_vm2, %v2497_v55, 0.0 }
 0x174   : > { %v1702_v18 = vadd.f32 %v1701_v12, %v1700_v10  ;;  %v1753_v16 = vadd.f32 %v1752_v45, %v1751_v6  ;;  %1685 = vst.msk [vmem:[%s3206_s25 + $0x38] sm:$0xff] %vm380_vm2, %v2499_v17  ;;  %v1738_v47 = vmul.f32 %v2499_v17, %v2499_v17  ;;  %v1707_v59 = vsel %vm380_vm2, %v2499_v17, 0.0 }
 0x175   : > { %v1754_v19 = vsel %vm380_vm2, %v1735_v13, 0.0  ;;  %1683 = vst.msk [vmem:[%s3206_s25 + $0x28] sm:$0xff] %vm380_vm2, %v2500_v15  ;;  %v1703_v20 = vsel %vm380_vm2, %v2500_v15, 0.0  ;;  %v1736_v21 = vmul.f32 %v2500_v15, %v2500_v15  ;;  %v1758_v0 = vsel %vm380_vm2, %v1737_v36, 0.0 }
 0x176   : > { %v1755_v37 = vadd.f32 %v1754_v19, %v1753_v16  ;;  %v1704_v42 = vadd.f32 %v1703_v20, %v1702_v18  ;;  %v1760_v14 = vsel %vm380_vm2, %v1738_v47, 0.0 }
 0x177   : > { %v2485_v44 = vpop.f32.mrb[8].mxu0  ;;  %v1756_v49 = vsel %vm380_vm2, %v1736_v21, 0.0 }
 0x178   : > { %v1706_v56 = vadd.f32 %v1705_v43, %v1704_v42  ;;  %v1630_v57 = vpop.f32.mrb[9].mxu0  ;;  %v1757_v62 = vadd.f32 %v1756_v49, %v1755_v37 }
 0x179   : > { %v2486_v1 = vpop.f32.mrb[10].mxu0 }
 0x17a   : > { %v1633_v4 = vpop.f32.mrb[11].mxu0  ;;  %v1708_v5 = vadd.f32 %v1707_v59, %v1706_v56  ;;  %v1759_v9 = vadd.f32 %v1758_v0, %v1757_v62 }
 0x17c   : > { %v1761_v25 = vadd.f32 %v1760_v14, %v1759_v9 }
 0x17d   : > { %v2413_v24 = vpop.f32.mrb[8].mxu1 }
 0x17e   : > { %v2501_v30 = vadd.f32 %v2485_v44, %v2413_v24  ;;  %v1126_v3 = vpop.f32.mrb[9].mxu1 }
 0x17f   : > { %v2502_v7 = vadd.f32 %v1630_v57, %v1126_v3  ;;  %v2414_v8 = vpop.f32.mrb[10].mxu1  ;;  %v2489_v22 = vpop.f32.mrb[12].mxu0 }
 0x180   : > { %1688 = vst.msk [vmem:[%s3206_s25 + $0x50] sm:$0xff] %vm380_vm2, %v2501_v30  ;;  %v2503_v23 = vadd.f32 %v2486_v1, %v2414_v8  ;;  %v1129_v26 = vpop.f32.mrb[11].mxu1  ;;  %v1646_v48 = vpop.f32.mrb[13].mxu0  ;;  %v1741_v32 = vmul.f32 %v2501_v30, %v2501_v30  ;;  %v1713_v41 = vsel %vm380_vm2, %v2501_v30, 0.0 }
 0x181   : > { %1686 = vst.msk [vmem:[%s3206_s25 + $0x40] sm:$0xff] %vm380_vm2, %v2502_v7  ;;  %v1709_v27 = vsel %vm380_vm2, %v2502_v7, 0.0  ;;  %v1739_v28 = vmul.f32 %v2502_v7, %v2502_v7  ;;  %v2504_v52 = vadd.f32 %v1633_v4, %v1129_v26  ;;  %v2490_v2 = vpop.f32.mrb[14].mxu0 }
 0x182   : > { %v1710_v29 = vadd.f32 %v1709_v27, %v1708_v5  ;;  %1689 = vst.msk [vmem:[%s3206_s25 + $0x58] sm:$0xff] %vm380_vm2, %v2503_v23  ;;  %v1649_v31 = vpop.f32.mrb[15].mxu0  ;;  %v1742_v39 = vmul.f32 %v2503_v23, %v2503_v23  ;;  %v1766_v60 = vsel %vm380_vm2, %v1741_v32, 0.0  ;;  %v1715_v61 = vsel %vm380_vm2, %v2503_v23, 0.0  ;;  %v1788_v27 = vld [vmem:[#allocation4] sm:$0x1] }
 0x183   : > { %v1762_v33 = vsel %vm380_vm2, %v1739_v28, 0.0  ;;  %1687 = vst.msk [vmem:[%s3206_s25 + $0x48] sm:$0xff] %vm380_vm2, %v2504_v52  ;;  %v1711_v34 = vsel %vm380_vm2, %v2504_v52, 0.0  ;;  %v1740_v35 = vmul.f32 %v2504_v52, %v2504_v52 }
 0x184   : > { %v1763_v38 = vadd.f32 %v1762_v33, %v1761_v25  ;;  %v1712_v40 = vadd.f32 %v1711_v34, %v1710_v29  ;;  %v1768_v45 = vsel %vm380_vm2, %v1742_v39, 0.0 }
 0x185   : > { %v1764_v46 = vsel %vm380_vm2, %v1740_v35, 0.0  ;;  %v2417_v50 = vpop.f32.mrb[12].mxu1 }
 0x186   : > { %v1714_v51 = vadd.f32 %v1713_v41, %v1712_v40  ;;  %v1765_v54 = vadd.f32 %v1764_v46, %v1763_v38  ;;  %v2505_v55 = vadd.f32 %v2489_v22, %v2417_v50  ;;  %v1142_v58 = vpop.f32.mrb[13].mxu1  ;;  %v1784_v22 = vld [vmem:[#allocation3] sm:$0x1] }
 0x187   : > { %v2506_v53 = vadd.f32 %v1646_v48, %v1142_v58  ;;  %v2418_v63 = vpop.f32.mrb[14].mxu1 }
 0x188   : > { %v1767_v6 = vadd.f32 %v1766_v60, %v1765_v54  ;;  %1692 = vst.msk [vmem:[%s3206_s25 + $0x70] sm:$0xff] %vm380_vm2, %v2505_v55  ;;  %v1716_v10 = vadd.f32 %v1715_v61, %v1714_v51  ;;  %v1145_v11 = vpop.f32.mrb[15].mxu1  ;;  %v2507_v17 = vadd.f32 %v2490_v2, %v2418_v63  ;;  %v1745_v36 = vmul.f32 %v2505_v55, %v2505_v55 }
 0x189   : > { %1690 = vst.msk [vmem:[%s3206_s25 + $0x60] sm:$0xff] %vm380_vm2, %v2506_v53  ;;  %v1717_v12 = vsel %vm380_vm2, %v2506_v53, 0.0  ;;  %v1743_v13 = vmul.f32 %v2506_v53, %v2506_v53  ;;  %v2508_v15 = vadd.f32 %v1649_v31, %v1145_v11  ;;  %v1721_v43 = vsel %vm380_vm2, %v2505_v55, 0.0 }
 0x18a   : > { %v1718_v18 = vadd.f32 %v1717_v12, %v1716_v10  ;;  %v1769_v16 = vadd.f32 %v1768_v45, %v1767_v6  ;;  %1693 = vst.msk [vmem:[%s3206_s25 + $0x78] sm:$0xff] %vm380_vm2, %v2507_v17  ;;  %v1746_v44 = vmul.f32 %v2507_v17, %v2507_v17  ;;  %v1723_v49 = vsel %vm380_vm2, %v2507_v17, 0.0 }
 0x18b   : > { %v1770_v19 = vsel %vm380_vm2, %v1743_v13, 0.0  ;;  %1691 = vst.msk [vmem:[%s3206_s25 + $0x68] sm:$0xff] %vm380_vm2, %v2508_v15  ;;  %v1719_v20 = vsel %vm380_vm2, %v2508_v15, 0.0  ;;  %v1744_v21 = vmul.f32 %v2508_v15, %v2508_v15  ;;  %v1774_v59 = vsel %vm380_vm2, %v1745_v36, 0.0 }
 0x18c   : > { %v1771_v37 = vadd.f32 %v1770_v19, %v1769_v16  ;;  %v1720_v42 = vadd.f32 %v1719_v20, %v1718_v18  ;;  %v1776_v0 = vsel %vm380_vm2, %v1746_v44, 0.0  ;;  %v1868_v31 = vlaneseq (!%p2237_p12) }
 0x18d   : > { %v1772_v56 = vsel %vm380_vm2, %v1744_v21, 0.0 }
 0x18e   : > { %v1722_v47 = vadd.f32 %v1721_v43, %v1720_v42  ;;  %v1773_v57 = vadd.f32 %v1772_v56, %v1771_v37  ;;  %v1869_v34 = vshrl.u32 (!%p2237_p12), %v1868_v31, 7  ;;  %v1804_v31 = vld [vmem:[%s2783_s10 + $0x8] sm:$0xff] (!%p2237_p12) }
 0x190   : > { %v1724_v62 = vadd.f32 %v1723_v49, %v1722_v47  ;;  %v1775_v1 = vadd.f32 %v1774_v59, %v1773_v57  ;;  %v1870_v39 = vsub.s32 (!%p2237_p12), 0, %v1869_v34 }
 0x192   : > { %v1725_v4 = vrot.slane %v1724_v62, 4  ;;  %v1777_v5 = vadd.f32 %v1776_v0, %v1775_v1  ;;  %v3273_v41 = vld [vmem:[#allocation2] sm:$0xff] (!%p2237_p12)  ;;  %v3275_v46 = vld [vmem:[#allocation2 + $0x8] sm:$0xff] (!%p2237_p12)  ;;  %v3279_v51 = vld [vmem:[#allocation2 + $0x10] sm:$0xff] (!%p2237_p12) }
 0x193   : > { %v3281_v54 = vld [vmem:[#allocation2 + $0x18] sm:$0xff] (!%p2237_p12)  ;;  %v3283_v55 = vld [vmem:[#allocation2 + $0x20] sm:$0xff] (!%p2237_p12)  ;;  %v3285_v58 = vld [vmem:[#allocation2 + $0x28] sm:$0xff] (!%p2237_p12) }
 0x194   : > { %v1726_v9 = vadd.f32 %v1725_v4, %v1724_v62  ;;  %v1778_v14 = vrot.slane %v1777_v5, 4  ;;  %v3287_v60 = vld [vmem:[#allocation2 + $0x30] sm:$0xff] (!%p2237_p12)  ;;  %v3289_v61 = vld [vmem:[#allocation2 + $0x38] sm:$0xff] (!%p2237_p12)  ;;  %v3291_v53 = vld [vmem:[#allocation2 + $0x40] sm:$0xff] (!%p2237_p12) }
 0x195   : > { %v3293_v63 = vld [vmem:[#allocation2 + $0x48] sm:$0xff] (!%p2237_p12)  ;;  %v3295_v45 = vld [vmem:[#allocation2 + $0x50] sm:$0xff] (!%p2237_p12)  ;;  %v3297_v6 = vld [vmem:[#allocation2 + $0x58] sm:$0xff] (!%p2237_p12) }
 0x196   : > { %v1727_v24 = vrot.slane %v1726_v9, 2  ;;  %v1779_v25 = vadd.f32 %v1778_v14, %v1777_v5  ;;  %v3299_v10 = vld [vmem:[#allocation2 + $0x60] sm:$0xff] (!%p2237_p12)  ;;  %v3301_v11 = vld [vmem:[#allocation2 + $0x68] sm:$0xff] (!%p2237_p12)  ;;  %v3309_v15 = vld [vmem:[#allocation2 + $0x70] sm:$0xff] (!%p2237_p12) }
 0x197   : > { %v3311_v18 = vld [vmem:[#allocation2 + $0x78] sm:$0xff] (!%p2237_p12)  ;;  %v3313_v16 = vld [vmem:[#allocation2 + $0x80] sm:$0xff] (!%p2237_p12)  ;;  %v3323_v42 = vld [vmem:[#allocation2 + $0x88] sm:$0xff] (!%p2237_p12) }
 0x198   : > { %v1728_v30 = vadd.f32 %v1727_v24, %v1726_v9  ;;  %v1780_v3 = vrot.slane %v1779_v25, 2  ;;  %v3325_v21 = vld [vmem:[#allocation2 + $0x90] sm:$0xff] (!%p2237_p12)  ;;  %v3327_v43 = vld [vmem:[#allocation2 + $0x98] sm:$0xff] (!%p2237_p12)  ;;  %v3337_v57 = vld [vmem:[#allocation2 + $0xa0] sm:$0xff] (!%p2237_p12) }
 0x199   : > { %v3339_v59 = vld [vmem:[#allocation2 + $0xa8] sm:$0xff] (!%p2237_p12)  ;;  %v3341_v62 = vld [vmem:[#allocation2 + $0xb0] sm:$0xff] (!%p2237_p12)  ;;  %v3351_v9 = vld [vmem:[#allocation2 + $0xb8] sm:$0xff] (!%p2237_p12) }
 0x19a   : > { %v1729_v7 = vrot.slane %v1728_v30, 1  ;;  %v1781_v8 = vadd.f32 %v1780_v3, %v1779_v25  ;;  %v3353_v14 = vld [vmem:[#allocation2 + $0xc0] sm:$0xff] (!%p2237_p12)  ;;  %v3355_v24 = vld [vmem:[#allocation2 + $0xc8] sm:$0xff] (!%p2237_p12) }
 0x19c   : > { %v1730_v23 = vadd.f32 %v1729_v7, %v1728_v30  ;;  %v1782_v26 = vrot.slane %v1781_v8, 1  ;;  %1794 = sbr.rel (%p2237_p12) target bundleno = 470 (0x1d6), region = 44 }
 0x19e   : > { %v1785_v48 = vadd.f32 %v1784_v22, %v1730_v23  ;;  %v1783_v28 = vadd.f32 %v1782_v26, %v1781_v8  ;;  %v3365_v8 = vld [vmem:[#allocation2 + $0xd0] sm:$0xff] (!%p2237_p12) }
 0x1a0   : > { %1787 = vst.msk [vmem:[#allocation3] sm:$0x1] %vm1786_vm9, %v1785_v48  ;;  %v1789_v52 = vadd.f32 %v1788_v27, %v1783_v28  ;;  %v3375_v28 = vld [vmem:[#allocation2 + $0xd8] sm:$0xff] (!%p2237_p12)  ;;  %v1812_v27 = vld [vmem:[%s2783_s10 + $0x48] sm:$0xff] (!%p2237_p12) }
 0x1a2   : > { %1790 = vst.msk [vmem:[#allocation4] sm:$0x1] %vm1786_vm9, %v1789_v52  ;;  %v3377_v52 = vld [vmem:[#allocation2 + $0xe0] sm:$0xff] (!%p2237_p12) }
 0x1a7   : > { %v1795_v2 = vld [vmem:[#allocation3] sm:$0x1] }
 0x1a8   : > { %v1796_v32 = vmul.f32 0.00390625, %v1795_v2  ;;  %v1803_v2 = vld [vmem:[%s2783_s10] sm:$0xff] }
 0x1a9   : > { %v1797_v29 = vld [vmem:[#allocation4] sm:$0x1] }
 0x1aa   : > { %v1798_v33 = vmul.f32 0.00390625, %v1797_v29  ;;  %v1799_v35 = vmul.f32 %v1796_v32, %v1796_v32  ;;  %v3277_v50 = vrot.slane %v1796_v32, %v1870_v39  ;;  %v1811_v32 = vld [vmem:[%s2783_s10 + $0x40] sm:$0xff] }
 0x1ac   : > { %v1800_v38 = vsub.f32 %v1798_v33, %v1799_v35  ;;  %v1873_v12 = vsub.f32 %v3273_v41, %v3277_v50  ;;  %v1874_v13 = vsub.f32 %v3275_v46, %v3277_v50  ;;  %v1875_v17 = vsub.f32 %v3279_v51, %v3277_v50  ;;  %v3389_v35 = vld [vmem:[#allocation2 + $0xe8] sm:$0xff]  ;;  %v1807_v41 = vld [vmem:[%s2783_s10 + $0x20] sm:$0xff]  ;;  %v1810_v46 = vld [vmem:[%s2783_s10 + $0x38] sm:$0xff] }
 0x1ad   : > { %v1876_v19 = vsub.f32 %v3281_v54, %v3277_v50  ;;  %v1877_v20 = vsub.f32 %v3283_v55, %v3277_v50  ;;  %v1878_v36 = vsub.f32 %v3285_v58, %v3277_v50  ;;  %v1879_v37 = vsub.f32 %v3287_v60, %v3277_v50 }
 0x1ae   : > { %v1801_v40 = vadd.f32 1e-05, %v1800_v38  ;;  %v1880_v44 = vsub.f32 %v3289_v61, %v3277_v50  ;;  %v1881_v47 = vsub.f32 %v3291_v53, %v3277_v50  ;;  %v1882_v56 = vsub.f32 %v3293_v63, %v3277_v50  ;;  %v1805_v38 = vld [vmem:[%s2783_s10 + $0x10] sm:$0xff] }
 0x1af   : > { %v1883_v49 = vsub.f32 %v3295_v45, %v3277_v50  ;;  %v1884_v1 = vsub.f32 %v3297_v6, %v3277_v50  ;;  %v1885_v0 = vsub.f32 %v3299_v10, %v3277_v50  ;;  %v1886_v4 = vsub.f32 %v3301_v11, %v3277_v50  ;;  %v1817_v53 = vld [vmem:[%s2783_s10 + $0x70] sm:$0xff] }
 0x1b0   : > { %2672 = vrsqrt.f32 %v1801_v40  ;;  %v1887_v5 = vsub.f32 %v3309_v15, %v3277_v50  ;;  %v1888_v25 = vsub.f32 %v3311_v18, %v3277_v50  ;;  %v1889_v30 = vsub.f32 %v3313_v16, %v3277_v50  ;;  %v1806_v40 = vld [vmem:[%s2783_s10 + $0x18] sm:$0xff]  ;;  %v1821_v18 = vld [vmem:[%s2783_s10 + $0x90] sm:$0xff] }
 0x1b1   : > { %v1890_v3 = vsub.f32 %v3323_v42, %v3277_v50  ;;  %v1891_v7 = vsub.f32 %v3325_v21, %v3277_v50  ;;  %v1892_v23 = vsub.f32 %v3327_v43, %v3277_v50  ;;  %v1825_v16 = vld [vmem:[%s2783_s10 + $0xb0] sm:$0xff]  ;;  %v3617_v42 = vsub.f32 %v3337_v57, %v3277_v50 }
 0x1b2   : > { %v3618_v43 = vsub.f32 %v3339_v59, %v3277_v50 }
 0x1ba   : > { %v2673_v22 = vpop.eup %2672 }
 0x1bb   : > { %v3380_v29 = vrot.slane %v2673_v22, %v1870_v39  ;;  %v1808_v22 = vld [vmem:[%s2783_s10 + $0x28] sm:$0xff]  ;;  %v1809_v39 = vld [vmem:[%s2783_s10 + $0x30] sm:$0xff] }
 0x1bd   : > { %v1911_v55 = vmul.f32 %v3380_v29, %v1873_v12  ;;  %v1912_v58 = vmul.f32 %v3380_v29, %v1874_v13  ;;  %v1913_v60 = vmul.f32 %v3380_v29, %v1875_v17  ;;  %v1914_v61 = vmul.f32 %v3380_v29, %v1876_v19 }
 0x1be   : > { %v1915_v51 = vmul.f32 %v3380_v29, %v1877_v20  ;;  %v1916_v54 = vmul.f32 %v3380_v29, %v1878_v36  ;;  %v1917_v12 = vmul.f32 %v3380_v29, %v1879_v37  ;;  %v1918_v13 = vmul.f32 %v3380_v29, %v1880_v44  ;;  %v1813_v37 = vld [vmem:[%s2783_s10 + $0x50] sm:$0xff]  ;;  %v1814_v44 = vld [vmem:[%s2783_s10 + $0x58] sm:$0xff] }
 0x1bf   : > { %v1943_v17 = vadd.f32 %v1911_v55, %v1803_v2  ;;  %v1944_v19 = vadd.f32 %v1912_v58, %v1804_v31  ;;  %v1945_v34 = vadd.f32 %v1913_v60, %v1805_v38  ;;  %v1946_v33 = vadd.f32 %v1914_v61, %v1806_v40  ;;  %v1815_v2 = vld [vmem:[%s2783_s10 + $0x60] sm:$0xff] }
 0x1c0   : > { %v1947_v48 = vadd.f32 %v1915_v51, %v1807_v41  ;;  %v1948_v20 = vadd.f32 %v1916_v54, %v1808_v22  ;;  %v1949_v36 = vadd.f32 %v1917_v12, %v1809_v39  ;;  %v1950_v26 = vadd.f32 %v1918_v13, %v1810_v46  ;;  %v1824_v51 = vld [vmem:[%s2783_s10 + $0xa8] sm:$0xff]  ;;  %v1826_v54 = vld [vmem:[%s2783_s10 + $0xb8] sm:$0xff]  ;;  %v1827_v61 = vld [vmem:[%s2783_s10 + $0xc0] sm:$0xff] }
 0x1c1   : > { %1975 = vst.msk [vmem:[%s2783_s10] sm:$0xff] %vm380_vm2, %v1943_v17  ;;  %1976 = vst.msk [vmem:[%s2783_s10 + $0x8] sm:$0xff] %vm380_vm2, %v1944_v19  ;;  %v1919_v31 = vmul.f32 %v3380_v29, %v1881_v47  ;;  %v1920_v38 = vmul.f32 %v3380_v29, %v1882_v56  ;;  %v1921_v40 = vmul.f32 %v3380_v29, %v1883_v49  ;;  %v1818_v47 = vld [vmem:[%s2783_s10 + $0x78] sm:$0xff]  ;;  %v1865_v22 = vld [vmem:[#allocation2 + $0xf0] sm:$0xff] }
 0x1c2   : > { %1977 = vst.msk [vmem:[%s2783_s10 + $0x10] sm:$0xff] %vm380_vm2, %v1945_v34  ;;  %1978 = vst.msk [vmem:[%s2783_s10 + $0x18] sm:$0xff] %vm380_vm2, %v1946_v33  ;;  %v1922_v33 = vmul.f32 %v3380_v29, %v1884_v1  ;;  %v1816_v34 = vld [vmem:[%s2783_s10 + $0x68] sm:$0xff]  ;;  %v1923_v63 = vmul.f32 %v3380_v29, %v1885_v0  ;;  %v1924_v45 = vmul.f32 %v3380_v29, %v1886_v4  ;;  %v1819_v0 = vld [vmem:[%s2783_s10 + $0x80] sm:$0xff] }
 0x1c3   : > { %1979 = vst.msk [vmem:[%s2783_s10 + $0x20] sm:$0xff] %vm380_vm2, %v1947_v48  ;;  %1980 = vst.msk [vmem:[%s2783_s10 + $0x28] sm:$0xff] %vm380_vm2, %v1948_v20  ;;  %v1925_v6 = vmul.f32 %v3380_v29, %v1887_v5  ;;  %v1926_v10 = vmul.f32 %v3380_v29, %v1888_v25  ;;  %v1951_v56 = vadd.f32 %v1919_v31, %v1811_v32  ;;  %v1820_v4 = vld [vmem:[%s2783_s10 + $0x88] sm:$0xff]  ;;  %v1822_v25 = vld [vmem:[%s2783_s10 + $0x98] sm:$0xff] }
 0x1c4   : > { %1981 = vst.msk [vmem:[%s2783_s10 + $0x30] sm:$0xff] %vm380_vm2, %v1949_v36  ;;  %1982 = vst.msk [vmem:[%s2783_s10 + $0x38] sm:$0xff] %vm380_vm2, %v1950_v26  ;;  %v1952_v49 = vadd.f32 %v1920_v38, %v1812_v27  ;;  %v1953_v11 = vadd.f32 %v1921_v40, %v1813_v37  ;;  %v1954_v1 = vadd.f32 %v1922_v33, %v1814_v44  ;;  %v1823_v32 = vld [vmem:[%s2783_s10 + $0xa0] sm:$0xff]  ;;  %v1866_v12 = vld [vmem:[#allocation2 + $0xf8] sm:$0xff] }
 0x1c5   : > { %v1955_v26 = vadd.f32 %v1923_v63, %v1815_v2  ;;  %v1956_v15 = vadd.f32 %v1924_v45, %v1816_v34  ;;  %v1957_v5 = vadd.f32 %v1925_v6, %v1817_v53  ;;  %v1958_v48 = vadd.f32 %v1926_v10, %v1818_v47  ;;  %1983 = vst.msk [vmem:[%s2783_s10 + $0x40] sm:$0xff] %vm380_vm2, %v1951_v56  ;;  %v1828_v19 = vld [vmem:[%s2783_s10 + $0xc8] sm:$0xff]  ;;  %v1829_v20 = vld [vmem:[%s2783_s10 + $0xd0] sm:$0xff]  ;;  %v1830_v36 = vld [vmem:[%s2783_s10 + $0xd8] sm:$0xff] }
 0x1c6   : > { %1984 = vst.msk [vmem:[%s2783_s10 + $0x48] sm:$0xff] %vm380_vm2, %v1952_v49  ;;  %1985 = vst.msk [vmem:[%s2783_s10 + $0x50] sm:$0xff] %vm380_vm2, %v1953_v11  ;;  %v1927_v27 = vmul.f32 %v3380_v29, %v1889_v30  ;;  %v1928_v41 = vmul.f32 %v3380_v29, %v1890_v3  ;;  %v1929_v39 = vmul.f32 %v3380_v29, %v1891_v7  ;;  %v1832_v53 = vld [vmem:[%s2783_s10 + $0xe8] sm:$0xff]  ;;  %v1833_v49 = vld [vmem:[%s2783_s10 + $0xf0] sm:$0xff] }
 0x1c7   : > { %1986 = vst.msk [vmem:[%s2783_s10 + $0x58] sm:$0xff] %vm380_vm2, %v1954_v1  ;;  %v1930_v46 = vmul.f32 %v3380_v29, %v1892_v23  ;;  %1987 = vst.msk [vmem:[%s2783_s10 + $0x60] sm:$0xff] %vm380_vm2, %v1955_v26  ;;  %v1931_v21 = vmul.f32 %v3380_v29, %v3617_v42  ;;  %v1932_v30 = vmul.f32 %v3380_v29, %v3618_v43  ;;  %v1834_v11 = vld [vmem:[%s2783_s10 + $0xf8] sm:$0xff] }
 0x1c8   : > { %1988 = vst.msk [vmem:[%s2783_s10 + $0x68] sm:$0xff] %vm380_vm2, %v1956_v15  ;;  %1989 = vst.msk [vmem:[%s2783_s10 + $0x70] sm:$0xff] %vm380_vm2, %v1957_v5  ;;  %v3619_v3 = vsub.f32 %v3341_v62, %v3277_v50  ;;  %v3620_v23 = vsub.f32 %v3351_v9, %v3277_v50  ;;  %v1959_v55 = vadd.f32 %v1927_v27, %v1819_v0 }
 0x1c9   : > { %1990 = vst.msk [vmem:[%s2783_s10 + $0x78] sm:$0xff] %vm380_vm2, %v1958_v48  ;;  %v1960_v58 = vadd.f32 %v1928_v41, %v1820_v4  ;;  %v1961_v59 = vadd.f32 %v1929_v39, %v1821_v18  ;;  %v1962_v60 = vadd.f32 %v1930_v46, %v1822_v25  ;;  %v1963_v62 = vadd.f32 %v1931_v21, %v1823_v32 }
 0x1ca   : > { %v1933_v7 = vmul.f32 %v3380_v29, %v3619_v3  ;;  %v1934_v57 = vmul.f32 %v3380_v29, %v3620_v23  ;;  %v1964_v13 = vadd.f32 %v1932_v30, %v1824_v51  ;;  %1991 = vst.msk [vmem:[%s2783_s10 + $0x80] sm:$0xff] %vm380_vm2, %v1959_v55  ;;  %v3621_v37 = vsub.f32 %v3353_v14, %v3277_v50  ;;  %v1831_v14 = vld [vmem:[%s2783_s10 + $0xe0] sm:$0xff] }
 0x1cb   : > { %1992 = vst.msk [vmem:[%s2783_s10 + $0x88] sm:$0xff] %vm380_vm2, %v1960_v58  ;;  %1993 = vst.msk [vmem:[%s2783_s10 + $0x90] sm:$0xff] %vm380_vm2, %v1961_v59  ;;  %v3622_v2 = vsub.f32 %v3355_v24, %v3277_v50  ;;  %v3623_v38 = vsub.f32 %v3365_v8, %v3277_v50  ;;  %v3624_v33 = vsub.f32 %v3375_v28, %v3277_v50 }
 0x1cc   : > { %v1965_v17 = vadd.f32 %v1933_v7, %v1825_v16  ;;  %v1966_v9 = vadd.f32 %v1934_v57, %v1826_v54  ;;  %1994 = vst.msk [vmem:[%s2783_s10 + $0x98] sm:$0xff] %vm380_vm2, %v1962_v60  ;;  %v1935_v44 = vmul.f32 %v3380_v29, %v3621_v37  ;;  %1995 = vst.msk [vmem:[%s2783_s10 + $0xa0] sm:$0xff] %vm380_vm2, %v1963_v62 }
 0x1cd   : > { %v1936_v31 = vmul.f32 %v3380_v29, %v3622_v2  ;;  %v1937_v40 = vmul.f32 %v3380_v29, %v3623_v38  ;;  %v1938_v34 = vmul.f32 %v3380_v29, %v3624_v33  ;;  %1996 = vst.msk [vmem:[%s2783_s10 + $0xa8] sm:$0xff] %vm380_vm2, %v1964_v13  ;;  %v3625_v24 = vsub.f32 %v3377_v52, %v3277_v50 }
 0x1ce   : > { %1997 = vst.msk [vmem:[%s2783_s10 + $0xb0] sm:$0xff] %vm380_vm2, %v1965_v17  ;;  %1998 = vst.msk [vmem:[%s2783_s10 + $0xb8] sm:$0xff] %vm380_vm2, %v1966_v9  ;;  %v3626_v28 = vsub.f32 %v3389_v35, %v3277_v50  ;;  %v1903_v63 = vsub.f32 %v1865_v22, %v3277_v50  ;;  %v1904_v45 = vsub.f32 %v1866_v12, %v3277_v50 }
 0x1cf   : > { %v1939_v8 = vmul.f32 %v3380_v29, %v3625_v24  ;;  %v1967_v6 = vadd.f32 %v1935_v44, %v1827_v61  ;;  %v1968_v10 = vadd.f32 %v1936_v31, %v1828_v19  ;;  %v1969_v56 = vadd.f32 %v1937_v40, %v1829_v20 }
 0x1d0   : > { %v1940_v47 = vmul.f32 %v3380_v29, %v3626_v28  ;;  %v1970_v52 = vadd.f32 %v1938_v34, %v1830_v36  ;;  %v1941_v0 = vmul.f32 %v3380_v29, %v1903_v63  ;;  %v1942_v4 = vmul.f32 %v3380_v29, %v1904_v45 }
 0x1d1   : > { %v1971_v1 = vadd.f32 %v1939_v8, %v1831_v14  ;;  %1999 = vst.msk [vmem:[%s2783_s10 + $0xc0] sm:$0xff] %vm380_vm2, %v1967_v6  ;;  %2000 = vst.msk [vmem:[%s2783_s10 + $0xc8] sm:$0xff] %vm380_vm2, %v1968_v10 }
 0x1d2   : > { %v1972_v35 = vadd.f32 %v1940_v47, %v1832_v53  ;;  %2001 = vst.msk [vmem:[%s2783_s10 + $0xd0] sm:$0xff] %vm380_vm2, %v1969_v56  ;;  %2002 = vst.msk [vmem:[%s2783_s10 + $0xd8] sm:$0xff] %vm380_vm2, %v1970_v52  ;;  %v1973_v50 = vadd.f32 %v1941_v0, %v1833_v49  ;;  %v1974_v26 = vadd.f32 %v1942_v4, %v1834_v11 }
 0x1d3   : > { %2003 = vst.msk [vmem:[%s2783_s10 + $0xe0] sm:$0xff] %vm380_vm2, %v1971_v1 }
 0x1d4   : > { %2004 = vst.msk [vmem:[%s2783_s10 + $0xe8] sm:$0xff] %vm380_vm2, %v1972_v35  ;;  %2005 = vst.msk [vmem:[%s2783_s10 + $0xf0] sm:$0xff] %vm380_vm2, %v1973_v50 }
 0x1d5   : > { %2006 = vst.msk [vmem:[%s2783_s10 + $0xf8] sm:$0xff] %vm380_vm2, %v1974_v26 }
 0x1d6 PF: > { %s14_s19 = sadd.s32 1, %s2712_s19   ;;  %s3627_s15 = smov %s2704_s17 }
 0x1d7   : > { %p11_p13 = scmp.ge.s32.totalorder %s14_s19, 6   ;;  %s3628_s16 = smov %s2708_s18 }
 0x1d8   : > { %s3629_s17 = smov %s3632_s20  ;;  %s3630_s18 = smov %s3636_s21 }
 0x1d9   :  { %13 = sbr.rel (!%p11_p13) target bundleno = 3 (0x3), region = 90 }

</bundles_post_ra>
